<compile_context>
chip_gen: v5e
topology: v5e:2x2
jax: 0.10.0
libtpu: 0.0.40
codegen_flags: <defaults>
</compile_context>

<pallas_src>
import jax
import jax.numpy as jnp
from jax.experimental import pallas as pl
from jax.experimental.pallas import tpu as pltpu


def _deep_biaffine_kernel(x_ref, w1_ref, b1_ref, w2_ref, b2_ref, wb_ref, o_ref,
                          a1_ref, a2t_ref):
    # x_ref  : (1, L, I)          activations for batch n (full rows: keys need all of L)
    # w1_ref : (I, Dp)            augmented W1^T (cols >= H are zero), Dp = pad128(H+1)
    # b1_ref : (1, Dp)            augmented b1 (entry H is 1.0, entries > H are 0)
    # w2_ref, b2_ref              same for the second projection
    # wb_ref : (Dp, o_tile*Dp)    channel tile of the padded bilinear weight
    # o_ref  : (1, tl, o_tile*L)  lane-dense output slab (channel-major packing)
    # a1_ref : (tl, Dp) f32 scratch   query-side projection for this L1 tile
    # a2t_ref: (Dp, L)  f32 scratch   key-side projection, pre-transposed
    l1 = pl.program_id(1)
    ob = pl.program_id(2)
    tl, dp = a1_ref.shape
    o_tile = wb_ref.shape[1] // dp

    # Projections (fused Linear + bias + ReLU + "append ones" via augmented
    # params: relu(x@0+1)=1, relu(x@0+0)=0) are computed once per (n, l1) and
    # cached in scratch across the channel-tile axis.  The single a2 transpose
    # is hoisted here so the per-channel contractions below are plain NN dots.
    @pl.when(ob == 0)
    def _():
        row0 = pl.multiple_of(l1 * tl, tl)
        x_tile = x_ref[0, pl.ds(row0, tl), :]                              # (tl, I)
        a1_ref[...] = jnp.maximum(
            jnp.dot(x_tile, w1_ref[...], preferred_element_type=jnp.float32)
            + b1_ref[...], 0.0)
        x_full = x_ref[0]                                                  # (L, I)
        a2 = jnp.maximum(
            jnp.dot(x_full, w2_ref[...], preferred_element_type=jnp.float32)
            + b2_ref[...], 0.0)                                            # (L, Dp)
        a2t_ref[...] = a2.T                                                # one hoisted transpose

    a1 = a1_ref[...]                                                       # (tl, Dp) f32
    a2t = a2t_ref[...]                                                     # (Dp, L)  f32

    # One wide, lane-dense MXU matmul over the whole channel tile.  Its live
    # size is bounded by the wrapper's o_tile selection (VMEM budget).
    inter = jnp.dot(a1, wb_ref[...], preferred_element_type=jnp.float32)   # (tl, o_tile*Dp)

    cols = []
    for j in range(o_tile):        # static unroll over the (bounded) channel tile
        inter_j = inter[:, j * dp:(j + 1) * dp]                            # aligned static view
        cols.append(jnp.dot(inter_j, a2t,
                            preferred_element_type=jnp.float32))           # (tl, L)
    # Single wide store of the packed slab (lane-dense last dim = o_tile*L).
    o_ref[0] = jnp.concatenate(cols, axis=-1).astype(o_ref.dtype)


def deep_biaffine_scorer(x, w1, b1, w2, b2, bilin_weight, *, o_tile=None,
                         l1_tile=None, param_dtype=None):
    """Forward pass of DeepBiaffineScorer (hidden_func=relu, dropout inactive).

    x: (N, L, I); w1, w2: (H, I); b1, b2: (H,); bilin_weight: (H+1, H+1, O).
    Returns (N, L, L, O), matching the PyTorch module's forward exactly.
    param_dtype=jnp.bfloat16 casts inputs/weights for v6e/v7x MXU rate (loosen
    validation tolerance accordingly); accumulation stays f32 either way.
    """
    N, L, I = x.shape
    H = w1.shape[0]
    D = H + 1
    O = bilin_weight.shape[-1]
    Dp = ((D + 127) // 128) * 128          # lane-aligned augmented hidden dim

    if param_dtype is not None:
        x = x.astype(param_dtype)
        w1, b1, w2, b2, bilin_weight = (t.astype(param_dtype)
                                        for t in (w1, b1, w2, b2, bilin_weight))
    w_dtype = w1.dtype

    # ---- parameter prep (hoistable once-per-weights) ------------------------
    # Augment W/b so the biaffine "append ones" feature falls out of the same
    # matmul, and zero-pad everything to the aligned Dp (numerically exact).
    w1_aug = jnp.zeros((I, Dp), w_dtype).at[:, :H].set(w1.T)
    w2_aug = jnp.zeros((I, Dp), w_dtype).at[:, :H].set(w2.T)
    b1_aug = jnp.zeros((1, Dp), w_dtype).at[0, :H].set(b1).at[0, H].set(1.0)
    b2_aug = jnp.zeros((1, Dp), w_dtype).at[0, :H].set(b2).at[0, H].set(1.0)
    # The torch .view() quirk: the effective bilinear tensor is
    # weight.reshape(D, O, D); pad both d1/d2 axes to Dp and flatten channel-major.
    wv = bilin_weight.reshape(D, O, D)
    wb_flat = (jnp.zeros((Dp, O, Dp), w_dtype).at[:D, :, :D].set(wv)
               .reshape(Dp, O * Dp))

    # ---- per-generation VMEM budget and tiling -------------------------------
    try:
        vmem_cap = int(getattr(pltpu.get_tpu_info(), "vmem_capacity_bytes",
                               64 * 1024 * 1024))
    except Exception:
        vmem_cap = 64 * 1024 * 1024
    # 3/4 of physical per-core VMEM, capped: 48 MiB on v7x, 96 MiB on v5e/v6e.
    vmem_budget = min((vmem_cap * 3) // 4, 96 * 1024 * 1024)

    if l1_tile is None:
        l1_tile = 128 if (L > 128 and L % 128 == 0) else L
    assert L % l1_tile == 0
    assert l1_tile == L or l1_tile % 8 == 0
    tl = l1_tile
    num_l1 = L // tl

    out_isize = x.dtype.itemsize
    w_isize = jnp.dtype(w_dtype).itemsize
    if o_tile is None:
        if L % 128 != 0:
            # Lane-dense output block must span the full channel dim unless
            # L itself is lane-aligned (parser-scale L is small anyway).
            o_tile = O
        else:
            per_o = (Dp * Dp * w_isize * 2          # weight tile (poss. double-buffered)
                     + tl * Dp * 4                  # `inter` live columns (f32)
                     + tl * L * out_isize * 2)      # output slab block (double-buffered)
            o_tile = max(1, min(O, (vmem_budget // 3) // max(per_o, 1)))
            while O % o_tile:
                o_tile -= 1
    assert O % o_tile == 0
    assert o_tile == O or (o_tile * L) % 128 == 0
    num_ob = O // o_tile

    grid = (N, num_l1, num_ob)

    flops = 2 * N * (L * I * Dp                    # W1 projection
                     + num_l1 * L * I * Dp         # W2 projection (per L1 tile)
                     + L * Dp * O * Dp             # a1 @ Wb
                     + L * L * O * Dp)             # per-channel (tl,Dp)@(Dp,L)
    bytes_accessed = (x.size * x.dtype.itemsize
                      + (w1_aug.size + w2_aug.size + b1_aug.size + b2_aug.size
                         + wb_flat.size) * w_isize
                      + N * L * L * O * out_isize)
    cost = pl.CostEstimate(flops=int(flops), transcendentals=0,
                           bytes_accessed=int(bytes_accessed))

    def build_call(single_buffer_consts):
        def const_spec(shape):
            idx = lambda n, l, ob: (0, 0)
            if single_buffer_consts:
                # Constant block index -> a single VMEM buffer is enough.
                return pl.BlockSpec(shape, idx, pipeline_mode=pl.Buffered(1))
            return pl.BlockSpec(shape, idx)

        wb_idx = lambda n, l, ob: (0, ob)
        if single_buffer_consts and num_ob == 1:
            wb_spec = pl.BlockSpec((Dp, o_tile * Dp), wb_idx,
                                   pipeline_mode=pl.Buffered(1))
        else:
            wb_spec = pl.BlockSpec((Dp, o_tile * Dp), wb_idx)

        return pl.pallas_call(
            _deep_biaffine_kernel,
            out_shape=jax.ShapeDtypeStruct((N, L, O * L), x.dtype),
            grid=grid,
            in_specs=[
                pl.BlockSpec((1, L, I), lambda n, l, ob: (n, 0, 0)),  # x[n] (constant across l/ob)
                const_spec((I, Dp)),                                   # W1 aug (resident)
                const_spec((1, Dp)),                                   # b1 aug
                const_spec((I, Dp)),                                   # W2 aug (resident)
                const_spec((1, Dp)),                                   # b2 aug
                wb_spec,                                               # bilinear-weight tile
            ],
            out_specs=pl.BlockSpec((1, tl, o_tile * L),
                                   lambda n, l, ob: (n, l, ob)),
            scratch_shapes=[pltpu.VMEM((tl, Dp), jnp.float32),         # a1 (query tile)
                            pltpu.VMEM((Dp, L), jnp.float32)],         # a2^T (all keys)
            compiler_params=pltpu.CompilerParams(
                dimension_semantics=("parallel", "parallel", "arbitrary"),
                vmem_limit_bytes=int(vmem_budget)),
            cost_estimate=cost,
        )

    args = (x, w1_aug, b1_aug, w2_aug, b2_aug, wb_flat)
    try:
        out_slab = build_call(True)(*args)
    except Exception:
        # Fallback for jax versions that reject pipeline_mode=pl.Buffered(1).
        out_slab = build_call(False)(*args)

    # (N, L1, O*L2) lane-dense slab -> (N, L1, L2, O): only a minor-axes
    # reshuffle remains; all in-kernel stores were wide/lane-dense.
    # TODO(synk): emit the interleaved (N, L1, L2*O) layout directly in-kernel
    # (zero-copy final reshape) once Mosaic lowers the required lane interleave.
    return jnp.transpose(out_slab.reshape(N, L, O, L), (0, 1, 3, 2))


def _torch_faithful_reference(x, w1, b1, w2, b2, weight):
    """Literal jnp transcription of the PyTorch DeepBiaffineScorer forward."""
    N, L, _ = x.shape
    H = w1.shape[0]
    D = H + 1
    O = weight.shape[-1]
    h1 = jax.nn.relu(x @ w1.T + b1)
    h2 = jax.nn.relu(x @ w2.T + b2)
    ones = jnp.ones((N, L, 1), x.dtype)
    a1 = jnp.concatenate([h1, ones], axis=-1)                           # (N, L, D)
    a2 = jnp.concatenate([h2, ones], axis=-1)                           # (N, L, D)
    inter = jnp.matmul(a1.reshape(-1, D), weight.reshape(D, D * O))     # (N*L, D*O)
    a2t = jnp.swapaxes(a2, 1, 2)                                        # (N, D, L)
    out = jnp.matmul(inter.reshape(N, L * O, D), a2t)                   # (N, L*O, L)
    out = out.reshape(N, L, O, L)
    return jnp.swapaxes(out, 2, 3)                                      # (N, L, L, O)


if __name__ == "__main__":
    N, L, I, H, O = 2, 8, 32, 32, 4

    key = jax.random.PRNGKey(0)
    kx, k1, kb1, k2, kb2, kw = jax.random.split(key, 6)
    x = jax.random.normal(kx, (N, L, I), dtype=jnp.float32)
    w1 = jax.random.normal(k1, (H, I), dtype=jnp.float32) * 0.1
    b1 = jax.random.normal(kb1, (H,), dtype=jnp.float32) * 0.1
    w2 = jax.random.normal(k2, (H, I), dtype=jnp.float32) * 0.1
    b2 = jax.random.normal(kb2, (H,), dtype=jnp.float32) * 0.1
    bilin_weight = jax.random.normal(kw, (H + 1, H + 1, O), dtype=jnp.float32) * 0.1
    # The module also owns a bilinear `bias` (O,) parameter, but its forward
    # never applies it, so it is omitted here (parameter parity only).

    out = jax.block_until_ready(deep_biaffine_scorer(x, w1, b1, w2, b2, bilin_weight))
    ref = jax.block_until_ready(_torch_faithful_reference(x, w1, b1, w2, b2, bilin_weight))

    assert out.shape == (N, L, L, O), out.shape
    max_err = float(jnp.max(jnp.abs(out - ref)))
    assert jnp.allclose(out, ref, rtol=1e-3, atol=1e-3), max_err

    print("KERNEL_OK")
</pallas_src>

<mosaic_0001>
module attributes {stable_mosaic.version = 11 : i64} {
  func.func @_deep_biaffine_kernel(%arg0: i32, %arg1: i32, %arg2: i32, %arg3: memref<1x8x32xf32, #tpu.memory_space<vmem>>, %arg4: memref<32x128xf32, #tpu.memory_space<vmem>>, %arg5: memref<1x128xf32, #tpu.memory_space<vmem>>, %arg6: memref<32x128xf32, #tpu.memory_space<vmem>>, %arg7: memref<1x128xf32, #tpu.memory_space<vmem>>, %arg8: memref<128x512xf32, #tpu.memory_space<vmem>>, %arg9: memref<1x8x32xf32, #tpu.memory_space<vmem>>, %arg10: memref<8x128xf32, #tpu.memory_space<vmem>>, %arg11: memref<128x8xf32, #tpu.memory_space<vmem>>) attributes {dimension_semantics = [#tpu.dimension_semantics<parallel>, #tpu.dimension_semantics<parallel>, #tpu.dimension_semantics<arbitrary>], iteration_bounds = array<i64: 2, 1, 1>, scalar_prefetch = 0 : i64, scratch_operands = 2 : i64, tpu.core_type = #tpu.core_type<tc>, window_params = [{transform_indices = @transform_0, window_bounds = array<i64: 1, 8, 32>}, {pipeline_mode = #tpu.pipeline_mode<synchronous>, transform_indices = @transform_1, window_bounds = array<i64: 32, 128>}, {pipeline_mode = #tpu.pipeline_mode<synchronous>, transform_indices = @transform_2, window_bounds = array<i64: 1, 128>}, {pipeline_mode = #tpu.pipeline_mode<synchronous>, transform_indices = @transform_3, window_bounds = array<i64: 32, 128>}, {pipeline_mode = #tpu.pipeline_mode<synchronous>, transform_indices = @transform_4, window_bounds = array<i64: 1, 128>}, {pipeline_mode = #tpu.pipeline_mode<synchronous>, transform_indices = @transform_5, window_bounds = array<i64: 128, 512>}, {transform_indices = @transform_6, window_bounds = array<i64: 1, 8, 32>}]} {
    %c0_i32 = arith.constant 0 : i32
    %0 = arith.cmpi eq, %arg2, %c0_i32 : i32
    %1 = arith.extui %0 : i1 to i32
    %c0_i32_0 = arith.constant 0 : i32
    %2 = arith.cmpi ne, %1, %c0_i32_0 : i32
    scf.if %2 {
      %c8_i32 = arith.constant 8 : i32
      %19 = arith.muli %arg1, %c8_i32 : i32
      %20 = tpu.assume_multiple %19, 8 : i32
      %c0_13 = arith.constant 0 : index
      %21 = arith.index_cast %20 : i32 to index
      %c0_14 = arith.constant 0 : index
      %22 = vector.load %arg3[%c0_13, %21, %c0_14] : memref<1x8x32xf32, #tpu.memory_space<vmem>>, vector<1x8x32xf32>
      %23 = vector.shape_cast %22 : vector<1x8x32xf32> to vector<8x32xf32>
      %c0_15 = arith.constant 0 : index
      %c0_16 = arith.constant 0 : index
      %24 = vector.load %arg4[%c0_15, %c0_16] : memref<32x128xf32, #tpu.memory_space<vmem>>, vector<32x128xf32>
      %cst_17 = arith.constant dense<0.000000e+00> : vector<8x128xf32>
      %25 = tpu.matmul %23, %24, %cst_17 {dimension_numbers = #tpu.dot_dimension_numbers<[1], [0], [0], [1], [0, 0, 1, 1], [], []>} : vector<8x32xf32>, vector<32x128xf32>, vector<8x128xf32> -> vector<8x128xf32>
      %c0_18 = arith.constant 0 : index
      %c0_19 = arith.constant 0 : index
      %26 = vector.load %arg5[%c0_18, %c0_19] : memref<1x128xf32, #tpu.memory_space<vmem>>, vector<1x128xf32>
      %27 = vector.broadcast %26 : vector<1x128xf32> to vector<8x128xf32>
      %28 = arith.addf %25, %27 : vector<8x128xf32>
      %cst_20 = arith.constant 0.000000e+00 : f32
      %29 = vector.broadcast %cst_20 : f32 to vector<8x128xf32>
      %30 = arith.maximumf %28, %29 : vector<8x128xf32>
      %c0_21 = arith.constant 0 : index
      %c0_22 = arith.constant 0 : index
      %31 = vector.load %arg10[%c0_21, %c0_22] : memref<8x128xf32, #tpu.memory_space<vmem>>, vector<8x128xf32>
      tpu.vector_store %arg10[%c0_21, %c0_22], %30 {strides = array<i32>} : memref<8x128xf32, #tpu.memory_space<vmem>>, vector<8x128xf32>,
      %c0_23 = arith.constant 0 : index
      %c0_24 = arith.constant 0 : index
      %c0_25 = arith.constant 0 : index
      %32 = vector.load %arg3[%c0_23, %c0_24, %c0_25] : memref<1x8x32xf32, #tpu.memory_space<vmem>>, vector<1x8x32xf32>
      %33 = vector.shape_cast %32 : vector<1x8x32xf32> to vector<8x32xf32>
      %c0_26 = arith.constant 0 : index
      %c0_27 = arith.constant 0 : index
      %34 = vector.load %arg6[%c0_26, %c0_27] : memref<32x128xf32, #tpu.memory_space<vmem>>, vector<32x128xf32>
      %cst_28 = arith.constant dense<0.000000e+00> : vector<8x128xf32>
      %35 = tpu.matmul %33, %34, %cst_28 {dimension_numbers = #tpu.dot_dimension_numbers<[1], [0], [0], [1], [0, 0, 1, 1], [], []>} : vector<8x32xf32>, vector<32x128xf32>, vector<8x128xf32> -> vector<8x128xf32>
      %c0_29 = arith.constant 0 : index
      %c0_30 = arith.constant 0 : index
      %36 = vector.load %arg7[%c0_29, %c0_30] : memref<1x128xf32, #tpu.memory_space<vmem>>, vector<1x128xf32>
      %37 = vector.broadcast %36 : vector<1x128xf32> to vector<8x128xf32>
      %38 = arith.addf %35, %37 : vector<8x128xf32>
      %cst_31 = arith.constant 0.000000e+00 : f32
      %39 = vector.broadcast %cst_31 : f32 to vector<8x128xf32>
      %40 = arith.maximumf %38, %39 : vector<8x128xf32>
      %41 = tpu.transpose %40, [1, 0] : vector<8x128xf32> -> vector<128x8xf32>
      %c0_32 = arith.constant 0 : index
      %c0_33 = arith.constant 0 : index
      %42 = vector.load %arg11[%c0_32, %c0_33] : memref<128x8xf32, #tpu.memory_space<vmem>>, vector<128x8xf32>
      tpu.vector_store %arg11[%c0_32, %c0_33], %41 {strides = array<i32>} : memref<128x8xf32, #tpu.memory_space<vmem>>, vector<128x8xf32>,
    } else {
    }
    %c0 = arith.constant 0 : index
    %c0_1 = arith.constant 0 : index
    %3 = vector.load %arg10[%c0, %c0_1] : memref<8x128xf32, #tpu.memory_space<vmem>>, vector<8x128xf32>
    %c0_2 = arith.constant 0 : index
    %c0_3 = arith.constant 0 : index
    %4 = vector.load %arg11[%c0_2, %c0_3] : memref<128x8xf32, #tpu.memory_space<vmem>>, vector<128x8xf32>
    %c0_4 = arith.constant 0 : index
    %c0_5 = arith.constant 0 : index
    %5 = vector.load %arg8[%c0_4, %c0_5] : memref<128x512xf32, #tpu.memory_space<vmem>>, vector<128x512xf32>
    %cst = arith.constant dense<0.000000e+00> : vector<8x512xf32>
    %6 = tpu.matmul %3, %5, %cst {dimension_numbers = #tpu.dot_dimension_numbers<[1], [0], [0], [1], [0, 0, 1, 1], [], []>} : vector<8x128xf32>, vector<128x512xf32>, vector<8x512xf32> -> vector<8x512xf32>
    %7 = vector.extract_strided_slice %6 {offsets = [0, 0], sizes = [8, 128], strides = [1, 1]} : vector<8x512xf32> to vector<8x128xf32>
    %cst_6 = arith.constant dense<0.000000e+00> : vector<8x8xf32>
    %8 = tpu.matmul %7, %4, %cst_6 {dimension_numbers = #tpu.dot_dimension_numbers<[1], [0], [0], [1], [0, 0, 1, 1], [], []>} : vector<8x128xf32>, vector<128x8xf32>, vector<8x8xf32> -> vector<8x8xf32>
    %9 = vector.extract_strided_slice %6 {offsets = [0, 128], sizes = [8, 128], strides = [1, 1]} : vector<8x512xf32> to vector<8x128xf32>
    %cst_7 = arith.constant dense<0.000000e+00> : vector<8x8xf32>
    %10 = tpu.matmul %9, %4, %cst_7 {dimension_numbers = #tpu.dot_dimension_numbers<[1], [0], [0], [1], [0, 0, 1, 1], [], []>} : vector<8x128xf32>, vector<128x8xf32>, vector<8x8xf32> -> vector<8x8xf32>
    %11 = vector.extract_strided_slice %6 {offsets = [0, 256], sizes = [8, 128], strides = [1, 1]} : vector<8x512xf32> to vector<8x128xf32>
    %cst_8 = arith.constant dense<0.000000e+00> : vector<8x8xf32>
    %12 = tpu.matmul %11, %4, %cst_8 {dimension_numbers = #tpu.dot_dimension_numbers<[1], [0], [0], [1], [0, 0, 1, 1], [], []>} : vector<8x128xf32>, vector<128x8xf32>, vector<8x8xf32> -> vector<8x8xf32>
    %13 = vector.extract_strided_slice %6 {offsets = [0, 384], sizes = [8, 128], strides = [1, 1]} : vector<8x512xf32> to vector<8x128xf32>
    %cst_9 = arith.constant dense<0.000000e+00> : vector<8x8xf32>
    %14 = tpu.matmul %13, %4, %cst_9 {dimension_numbers = #tpu.dot_dimension_numbers<[1], [0], [0], [1], [0, 0, 1, 1], [], []>} : vector<8x128xf32>, vector<128x8xf32>, vector<8x8xf32> -> vector<8x8xf32>
    %15 = tpu.concatenate %8, %10, %12, %14 in 1 : vector<8x8xf32>, vector<8x8xf32>, vector<8x8xf32>, vector<8x8xf32> -> vector<8x32xf32>
    %c0_10 = arith.constant 0 : index
    %c0_11 = arith.constant 0 : index
    %c0_12 = arith.constant 0 : index
    %16 = vector.load %arg9[%c0_10, %c0_11, %c0_12] : memref<1x8x32xf32, #tpu.memory_space<vmem>>, vector<1x8x32xf32>
    %17 = vector.shape_cast %16 : vector<1x8x32xf32> to vector<8x32xf32>
    %18 = vector.shape_cast %15 : vector<8x32xf32> to vector<1x8x32xf32>
    tpu.vector_store %arg9[%c0_10, %c0_11, %c0_12], %18 {strides = array<i32>} : memref<1x8x32xf32, #tpu.memory_space<vmem>>, vector<1x8x32xf32>,
    return
  }
  func.func @transform_0(%arg0: i32, %arg1: i32, %arg2: i32) -> (i32, i32, i32) {
    %c0_i32 = arith.constant 0 : i32
    %c0_i32_0 = arith.constant 0 : i32
    %c0_i32_1 = arith.constant 0 : i32
    return %arg0, %c0_i32, %c0_i32_0 : i32, i32, i32
  }
  func.func @transform_1(%arg0: i32, %arg1: i32, %arg2: i32) -> (i32, i32) {
    %c0_i32 = arith.constant 0 : i32
    %c0_i32_0 = arith.constant 0 : i32
    %c0_i32_1 = arith.constant 0 : i32
    return %c0_i32, %c0_i32_0 : i32, i32
  }
  func.func @transform_2(%arg0: i32, %arg1: i32, %arg2: i32) -> (i32, i32) {
    %c0_i32 = arith.constant 0 : i32
    %c0_i32_0 = arith.constant 0 : i32
    %c0_i32_1 = arith.constant 0 : i32
    return %c0_i32, %c0_i32_0 : i32, i32
  }
  func.func @transform_3(%arg0: i32, %arg1: i32, %arg2: i32) -> (i32, i32) {
    %c0_i32 = arith.constant 0 : i32
    %c0_i32_0 = arith.constant 0 : i32
    %c0_i32_1 = arith.constant 0 : i32
    return %c0_i32, %c0_i32_0 : i32, i32
  }
  func.func @transform_4(%arg0: i32, %arg1: i32, %arg2: i32) -> (i32, i32) {
    %c0_i32 = arith.constant 0 : i32
    %c0_i32_0 = arith.constant 0 : i32
    %c0_i32_1 = arith.constant 0 : i32
    return %c0_i32, %c0_i32_0 : i32, i32
  }
  func.func @transform_5(%arg0: i32, %arg1: i32, %arg2: i32) -> (i32, i32) {
    %c0_i32 = arith.constant 0 : i32
    %c0_i32_0 = arith.constant 0 : i32
    return %c0_i32, %arg2 : i32, i32
  }
  func.func @transform_6(%arg0: i32, %arg1: i32, %arg2: i32) -> (i32, i32, i32) {
    %c0_i32 = arith.constant 0 : i32
    return %arg0, %arg1, %arg2 : i32, i32, i32
  }
}

module attributes {stable_mosaic.version = 11 : i64} {
  func.func @_deep_biaffine_kernel(%arg0: i32, %arg1: i32, %arg2: i32, %arg3: memref<1x8x32xf32, #tpu.memory_space<vmem>>, %arg4: memref<32x128xf32, #tpu.memory_space<vmem>>, %arg5: memref<1x128xf32, #tpu.memory_space<vmem>>, %arg6: memref<32x128xf32, #tpu.memory_space<vmem>>, %arg7: memref<1x128xf32, #tpu.memory_space<vmem>>, %arg8: memref<128x512xf32, #tpu.memory_space<vmem>>, %arg9: memref<1x8x32xf32, #tpu.memory_space<vmem>>, %arg10: memref<8x128xf32, #tpu.memory_space<vmem>>, %arg11: memref<128x8xf32, #tpu.memory_space<vmem>>) attributes {dimension_semantics = [#tpu.dimension_semantics<parallel>, #tpu.dimension_semantics<parallel>, #tpu.dimension_semantics<arbitrary>], iteration_bounds = array<i64: 2, 1, 1>, scalar_prefetch = 0 : i64, scratch_operands = 2 : i64, tpu.core_type = #tpu.core_type<tc>, window_params = [{transform_indices = @transform_0, window_bounds = array<i64: 1, 8, 32>}, {pipeline_mode = #tpu.pipeline_mode<synchronous>, transform_indices = @transform_1, window_bounds = array<i64: 32, 128>}, {pipeline_mode = #tpu.pipeline_mode<synchronous>, transform_indices = @transform_2, window_bounds = array<i64: 1, 128>}, {pipeline_mode = #tpu.pipeline_mode<synchronous>, transform_indices = @transform_3, window_bounds = array<i64: 32, 128>}, {pipeline_mode = #tpu.pipeline_mode<synchronous>, transform_indices = @transform_4, window_bounds = array<i64: 1, 128>}, {transform_indices = @transform_5, window_bounds = array<i64: 128, 512>}, {transform_indices = @transform_6, window_bounds = array<i64: 1, 8, 32>}]} {
    %c0_i32 = arith.constant 0 : i32
    %0 = arith.cmpi eq, %arg2, %c0_i32 : i32
    %1 = arith.extui %0 : i1 to i32
    %c0_i32_0 = arith.constant 0 : i32
    %2 = arith.cmpi ne, %1, %c0_i32_0 : i32
    scf.if %2 {
      %c8_i32 = arith.constant 8 : i32
      %19 = arith.muli %arg1, %c8_i32 : i32
      %20 = tpu.assume_multiple %19, 8 : i32
      %c0_13 = arith.constant 0 : index
      %21 = arith.index_cast %20 : i32 to index
      %c0_14 = arith.constant 0 : index
      %22 = vector.load %arg3[%c0_13, %21, %c0_14] : memref<1x8x32xf32, #tpu.memory_space<vmem>>, vector<1x8x32xf32>
      %23 = vector.shape_cast %22 : vector<1x8x32xf32> to vector<8x32xf32>
      %c0_15 = arith.constant 0 : index
      %c0_16 = arith.constant 0 : index
      %24 = vector.load %arg4[%c0_15, %c0_16] : memref<32x128xf32, #tpu.memory_space<vmem>>, vector<32x128xf32>
      %cst_17 = arith.constant dense<0.000000e+00> : vector<8x128xf32>
      %25 = tpu.matmul %23, %24, %cst_17 {dimension_numbers = #tpu.dot_dimension_numbers<[1], [0], [0], [1], [0, 0, 1, 1], [], []>} : vector<8x32xf32>, vector<32x128xf32>, vector<8x128xf32> -> vector<8x128xf32>
      %c0_18 = arith.constant 0 : index
      %c0_19 = arith.constant 0 : index
      %26 = vector.load %arg5[%c0_18, %c0_19] : memref<1x128xf32, #tpu.memory_space<vmem>>, vector<1x128xf32>
      %27 = vector.broadcast %26 : vector<1x128xf32> to vector<8x128xf32>
      %28 = arith.addf %25, %27 : vector<8x128xf32>
      %cst_20 = arith.constant 0.000000e+00 : f32
      %29 = vector.broadcast %cst_20 : f32 to vector<8x128xf32>
      %30 = arith.maximumf %28, %29 : vector<8x128xf32>
      %c0_21 = arith.constant 0 : index
      %c0_22 = arith.constant 0 : index
      %31 = vector.load %arg10[%c0_21, %c0_22] : memref<8x128xf32, #tpu.memory_space<vmem>>, vector<8x128xf32>
      tpu.vector_store %arg10[%c0_21, %c0_22], %30 {strides = array<i32>} : memref<8x128xf32, #tpu.memory_space<vmem>>, vector<8x128xf32>,
      %c0_23 = arith.constant 0 : index
      %c0_24 = arith.constant 0 : index
      %c0_25 = arith.constant 0 : index
      %32 = vector.load %arg3[%c0_23, %c0_24, %c0_25] : memref<1x8x32xf32, #tpu.memory_space<vmem>>, vector<1x8x32xf32>
      %33 = vector.shape_cast %32 : vector<1x8x32xf32> to vector<8x32xf32>
      %c0_26 = arith.constant 0 : index
      %c0_27 = arith.constant 0 : index
      %34 = vector.load %arg6[%c0_26, %c0_27] : memref<32x128xf32, #tpu.memory_space<vmem>>, vector<32x128xf32>
      %cst_28 = arith.constant dense<0.000000e+00> : vector<8x128xf32>
      %35 = tpu.matmul %33, %34, %cst_28 {dimension_numbers = #tpu.dot_dimension_numbers<[1], [0], [0], [1], [0, 0, 1, 1], [], []>} : vector<8x32xf32>, vector<32x128xf32>, vector<8x128xf32> -> vector<8x128xf32>
      %c0_29 = arith.constant 0 : index
      %c0_30 = arith.constant 0 : index
      %36 = vector.load %arg7[%c0_29, %c0_30] : memref<1x128xf32, #tpu.memory_space<vmem>>, vector<1x128xf32>
      %37 = vector.broadcast %36 : vector<1x128xf32> to vector<8x128xf32>
      %38 = arith.addf %35, %37 : vector<8x128xf32>
      %cst_31 = arith.constant 0.000000e+00 : f32
      %39 = vector.broadcast %cst_31 : f32 to vector<8x128xf32>
      %40 = arith.maximumf %38, %39 : vector<8x128xf32>
      %41 = tpu.transpose %40, [1, 0] : vector<8x128xf32> -> vector<128x8xf32>
      %c0_32 = arith.constant 0 : index
      %c0_33 = arith.constant 0 : index
      %42 = vector.load %arg11[%c0_32, %c0_33] : memref<128x8xf32, #tpu.memory_space<vmem>>, vector<128x8xf32>
      tpu.vector_store %arg11[%c0_32, %c0_33], %41 {strides = array<i32>} : memref<128x8xf32, #tpu.memory_space<vmem>>, vector<128x8xf32>,
    } else {
    }
    %c0 = arith.constant 0 : index
    %c0_1 = arith.constant 0 : index
    %3 = vector.load %arg10[%c0, %c0_1] : memref<8x128xf32, #tpu.memory_space<vmem>>, vector<8x128xf32>
    %c0_2 = arith.constant 0 : index
    %c0_3 = arith.constant 0 : index
    %4 = vector.load %arg11[%c0_2, %c0_3] : memref<128x8xf32, #tpu.memory_space<vmem>>, vector<128x8xf32>
    %c0_4 = arith.constant 0 : index
    %c0_5 = arith.constant 0 : index
    %5 = vector.load %arg8[%c0_4, %c0_5] : memref<128x512xf32, #tpu.memory_space<vmem>>, vector<128x512xf32>
    %cst = arith.constant dense<0.000000e+00> : vector<8x512xf32>
    %6 = tpu.matmul %3, %5, %cst {dimension_numbers = #tpu.dot_dimension_numbers<[1], [0], [0], [1], [0, 0, 1, 1], [], []>} : vector<8x128xf32>, vector<128x512xf32>, vector<8x512xf32> -> vector<8x512xf32>
    %7 = vector.extract_strided_slice %6 {offsets = [0, 0], sizes = [8, 128], strides = [1, 1]} : vector<8x512xf32> to vector<8x128xf32>
    %cst_6 = arith.constant dense<0.000000e+00> : vector<8x8xf32>
    %8 = tpu.matmul %7, %4, %cst_6 {dimension_numbers = #tpu.dot_dimension_numbers<[1], [0], [0], [1], [0, 0, 1, 1], [], []>} : vector<8x128xf32>, vector<128x8xf32>, vector<8x8xf32> -> vector<8x8xf32>
    %9 = vector.extract_strided_slice %6 {offsets = [0, 128], sizes = [8, 128], strides = [1, 1]} : vector<8x512xf32> to vector<8x128xf32>
    %cst_7 = arith.constant dense<0.000000e+00> : vector<8x8xf32>
    %10 = tpu.matmul %9, %4, %cst_7 {dimension_numbers = #tpu.dot_dimension_numbers<[1], [0], [0], [1], [0, 0, 1, 1], [], []>} : vector<8x128xf32>, vector<128x8xf32>, vector<8x8xf32> -> vector<8x8xf32>
    %11 = vector.extract_strided_slice %6 {offsets = [0, 256], sizes = [8, 128], strides = [1, 1]} : vector<8x512xf32> to vector<8x128xf32>
    %cst_8 = arith.constant dense<0.000000e+00> : vector<8x8xf32>
    %12 = tpu.matmul %11, %4, %cst_8 {dimension_numbers = #tpu.dot_dimension_numbers<[1], [0], [0], [1], [0, 0, 1, 1], [], []>} : vector<8x128xf32>, vector<128x8xf32>, vector<8x8xf32> -> vector<8x8xf32>
    %13 = vector.extract_strided_slice %6 {offsets = [0, 384], sizes = [8, 128], strides = [1, 1]} : vector<8x512xf32> to vector<8x128xf32>
    %cst_9 = arith.constant dense<0.000000e+00> : vector<8x8xf32>
    %14 = tpu.matmul %13, %4, %cst_9 {dimension_numbers = #tpu.dot_dimension_numbers<[1], [0], [0], [1], [0, 0, 1, 1], [], []>} : vector<8x128xf32>, vector<128x8xf32>, vector<8x8xf32> -> vector<8x8xf32>
    %15 = tpu.concatenate %8, %10, %12, %14 in 1 : vector<8x8xf32>, vector<8x8xf32>, vector<8x8xf32>, vector<8x8xf32> -> vector<8x32xf32>
    %c0_10 = arith.constant 0 : index
    %c0_11 = arith.constant 0 : index
    %c0_12 = arith.constant 0 : index
    %16 = vector.load %arg9[%c0_10, %c0_11, %c0_12] : memref<1x8x32xf32, #tpu.memory_space<vmem>>, vector<1x8x32xf32>
    %17 = vector.shape_cast %16 : vector<1x8x32xf32> to vector<8x32xf32>
    %18 = vector.shape_cast %15 : vector<8x32xf32> to vector<1x8x32xf32>
    tpu.vector_store %arg9[%c0_10, %c0_11, %c0_12], %18 {strides = array<i32>} : memref<1x8x32xf32, #tpu.memory_space<vmem>>, vector<1x8x32xf32>,
    return
  }
  func.func @transform_0(%arg0: i32, %arg1: i32, %arg2: i32) -> (i32, i32, i32) {
    %c0_i32 = arith.constant 0 : i32
    %c0_i32_0 = arith.constant 0 : i32
    %c0_i32_1 = arith.constant 0 : i32
    return %arg0, %c0_i32, %c0_i32_0 : i32, i32, i32
  }
  func.func @transform_1(%arg0: i32, %arg1: i32, %arg2: i32) -> (i32, i32) {
    %c0_i32 = arith.constant 0 : i32
    %c0_i32_0 = arith.constant 0 : i32
    %c0_i32_1 = arith.constant 0 : i32
    return %c0_i32, %c0_i32_0 : i32, i32
  }
  func.func @transform_2(%arg0: i32, %arg1: i32, %arg2: i32) -> (i32, i32) {
    %c0_i32 = arith.constant 0 : i32
    %c0_i32_0 = arith.constant 0 : i32
    %c0_i32_1 = arith.constant 0 : i32
    return %c0_i32, %c0_i32_0 : i32, i32
  }
  func.func @transform_3(%arg0: i32, %arg1: i32, %arg2: i32) -> (i32, i32) {
    %c0_i32 = arith.constant 0 : i32
    %c0_i32_0 = arith.constant 0 : i32
    %c0_i32_1 = arith.constant 0 : i32
    return %c0_i32, %c0_i32_0 : i32, i32
  }
  func.func @transform_4(%arg0: i32, %arg1: i32, %arg2: i32) -> (i32, i32) {
    %c0_i32 = arith.constant 0 : i32
    %c0_i32_0 = arith.constant 0 : i32
    %c0_i32_1 = arith.constant 0 : i32
    return %c0_i32, %c0_i32_0 : i32, i32
  }
  func.func @transform_5(%arg0: i32, %arg1: i32, %arg2: i32) -> (i32, i32) {
    %c0_i32 = arith.constant 0 : i32
    %c0_i32_0 = arith.constant 0 : i32
    return %c0_i32, %arg2 : i32, i32
  }
  func.func @transform_6(%arg0: i32, %arg1: i32, %arg2: i32) -> (i32, i32, i32) {
    %c0_i32 = arith.constant 0 : i32
    return %arg0, %arg1, %arg2 : i32, i32, i32
  }
}

</mosaic_0001>

<bundles_post_ra>
// kernel: tpu_custom_call.1
= control target key start
LH: loop header
LB: loop body
LE: loop exit
PB: predicated region body
PF: predicated region fallthrough
CT: control target
= control target key end

     0   :  { %s1447_s0 = inlined_call_operand.hbm [shape: f32[2,8,32], index: 0, kind: input, shape index: {}]   ;;  %s1448_s1 = inlined_call_operand.hbm [shape: f32[32,128], index: 1, kind: input, shape index: {}]   ;;  %s1449_s2 = inlined_call_operand.vmem [shape: f32[1,128], index: 2, kind: input, shape index: {}]   ;;  %s1450_s3 = inlined_call_operand.hbm [shape: f32[32,128], index: 3, kind: input, shape index: {}]   ;;  %s1451_s4 = inlined_call_operand.vmem [shape: f32[1,128], index: 4, kind: input, shape index: {}]   ;;  %s1452_s5 = inlined_call_operand.hbm [shape: f32[128,512], index: 5, kind: input, shape index: {}]   ;;  %s1453_s6 = inlined_call_operand.hbm [shape: f32[2,8,32], index: 6, kind: output, shape index: {}]  }
   0x1   :  { %1454 = sst [smem:[#allocation17_spill]] %s1448_s1 }
   0x2   :  { %11 = vsyncpa [#allocation5], 0 }
   0x3   :  { %13 = vsyncpa [#allocation5 + $0x1], 0 }
   0x4   :  { %14 = vsyncpa [#allocation8], 0 }
   0x5   :  { %15 = vsyncpa [#allocation11], 0 }
   0x6   :  { %16 = vsyncpa [#allocation6], 0 }
   0x7   :  { %18 = vsyncpa [#allocation6 + $0x1], 0  ;;  %s1250_s21 = smov 0   ;;  %s1252_s22 = smov 0  }
   0x8   :  { %s1254_s23 = smov 0   ;;  %s1256_s24 = smov 0  }
   0x9   :  { %s1258_s25 = smov 0   ;;  %s1260_s26 = smov 0  }
   0xa LB: > { %s869_s27 = sadd.s32 4294967295, %s1203_s26   ;;  %p871_p0 = scmp.ge.s32.totalorder %s1203_s26, 1  ;;  %s1203_s26 = sphi %s1260_s26, %s24_s26   ;;  %s1199_s25 = sphi %s1258_s25, %s1467_s25   ;;  %s1195_s24 = sphi %s1256_s24, %s1466_s24   ;;  %s1191_s23 = sphi %s1254_s23, %s1465_s23   ;;  %s1187_s22 = sphi %s1252_s22, %s1464_s22   ;;  %s1183_s21 = sphi %s1250_s21, %s1463_s21  }
   0xb   : > { %p1284_p1 = scmp.eq.s32.totalorder %s869_s27, 0  ;;  %p214_p2 = scmp.lt.s32.totalorder %s1203_s26, 3 }
   0xc   : > { %s1456_s1 = sld [smem:[#allocation17_spill]]  ;;  %s1205_s9 = smov [#allocation7]  }
   0xd   : > { %p1292_p3 = pnand %p871_p0, %p214_p2  ;;  %s227_s10 = sshll.u32 %s1205_s9, 4  ;;  %s228_s10 = int_to_ptr.vmem [resolvable:$true] %s227_s10 }
   0xe   : > { %p875_p6 = scmp.ge.s32.totalorder %s1203_s26, 2  ;;  %s242_s14 = sshll.u32 %s1450_s3, 4  ;;  %s243_s14 = int_to_ptr.hbm [resolvable:$true] %s242_s14 }
   0xf   : > { %p906_p4 = pneg %p1292_p3  ;;  %s1206_s15 = smov 128  }
  0x10   : > { %s1207_s16 = smov 8   ;;  %s1208_s17 = smov [#allocation9]  }
  0x11   : > { %p1300_p5 = pnand %p906_p4, %p1284_p1  ;;  %s244_s18 = sshll.u32 %s1208_s17, 4  ;;  %s245_s18 = int_to_ptr.vmem [resolvable:$true] %s244_s18 }
  0x12   : > { %s225_s7 = sshll.u32 %s1456_s1, 4  ;;  %s262_s29 = sshll.u32 %s1452_s5, 4  ;;  %s226_s7 = int_to_ptr.hbm [resolvable:$true] %s225_s7  ;;  %s263_s29 = int_to_ptr.hbm [resolvable:$true] %s262_s29 }
  0x13   : > { %909 = dma.hbm_to_vmem [thread:$0]  (!%p1300_p5), %s226_s7, 512, %s228_s10, [#allocation8], %s1206_s15, %s1206_s15, %s1207_s16  }
  0x14   : > { %912 = dma.hbm_to_vmem [thread:$0]  (!%p1300_p5), %s243_s14, 512, %s245_s18, [#allocation8], %s1206_s15, %s1206_s15, %s1207_s16  }
  0x15   : > { %s1209_s30 = smov [#allocation10]   ;;  %s1210_s7 = smov 512  }
  0x16   : > { %s264_s9 = sshll.u32 %s1209_s30, 4  ;;  %s1211_s10 = smov 32   ;;  %s265_s9 = int_to_ptr.vmem [resolvable:$true] %s264_s9 }
  0x17   : > { %915 = dma.hbm_to_vmem [thread:$0]  (!%p1300_p5), %s263_s29, 8192, %s265_s9, [#allocation11], %s1210_s7, %s1210_s7, %s1211_s10  }
  0x18   : > { %s870_s12 = sadd.s32 4294967294, %s1203_s26   ;;  %s43_s13 = sadd.s32 1, %s1199_s25 }
  0x19   : > { %s50_s17 = sadd.s32 1, %s1191_s23  ;;  %p45_p7 = scmp.ge.s32.totalorder %s43_s13, 2 }
  0x1a   : > { %p57_p8 = scmp.ne.s32.totalorder %s1191_s23, %s1187_s22  ;;  %p58_p9 = scmp.eq.s32.totalorder %s1203_s26, 0 }
  0x1b   : > { %p63_p10 = scmp.ne.s32.totalorder %s1187_s22, %s1183_s21  ;;  %s1469_s13 = smov (%p45_p7, %s43_s13), 0 }
  0x1c   : > { %p1327_p11 = por %p58_p9, %p57_p8  ;;  %s47_s15 = ssub.s32 %s1199_s25, %s1469_s13 }
  0x1d   : > { %p1333_p12 = por %p1284_p1, %p63_p10  ;;  %p201_p13 = scmp.eq.s32.totalorder %s869_s27, 1 }
  0x1e   : > { %p48_p0 = scmp.eq.s32.totalorder %s47_s15, 0  ;;  %p207_p2 = scmp.eq.s32.totalorder %s870_s12, 1 }
  0x1f   : > { %p1341_p4 = por %p201_p13, %p57_p8  ;;  %p927_p5 = scmp.lt.s32.totalorder %s1203_s26, 2 }
  0x20   : > { %s1347_s18 = scalar_select %p48_p0, %s1191_s23, %s50_s17  }
  0x21   : > { %p1349_p7 = por %p207_p2, %p63_p10  ;;  %s278_s20 = sand.u32 1, %s1191_s23  }
  0x22   : > { %s876_s29 = sshll.u32 %s278_s20, 3  ;;  %s877_s30 = sshll.u32 %s1199_s25, 3 }
  0x23   : > { %s286_s27 = scalar_lea.hbm %s1447_s0, %s877_s30  ;;  %s282_s10 = scalar_lea.vmem [#allocation4], %s876_s29 }
  0x24   : > { %s290_s12 = sshll.u32 %s282_s10, 4  ;;  %s288_s15 = sshll.u32 %s286_s27, 4  ;;  %s291_s12 = int_to_ptr.vmem [resolvable:$true] %s290_s12  ;;  %s289_s15 = int_to_ptr.hbm [resolvable:$true] %s288_s15 }
  0x25   : > { %p917_p8 = pnand %p927_p5, %p1327_p11  ;;  %s279_s17 = scalar_lea.sflag [#allocation5], %s278_s20 }
  0x26   : > { %299 = sbr.rel (%p1292_p3) target bundleno = 765 (0x2fd), region = 44  ;;  %s1363_s1 = sand.u32 (!%p1292_p3), 1, %s1187_s22  }
  0x27   : > { %919 = dma.hbm_to_vmem [thread:$0]  (!%p917_p8), %s289_s15, 128, %s291_s12, %s279_s17  }
  0x28   : > { %s879_s30 = sshll.u32 (!%p1292_p3), %s1363_s1, 3  ;;  %s302_s29 = scalar_lea.sflag (!%p1292_p3), [#allocation5], %s1363_s1 }
  0x29   : > { %s305_s9 = scalar_lea.vmem (!%p1292_p3), [#allocation4], %s879_s30 }
  0x2b   : > { %1166 = dma.done.wait (%p1333_p12), %s302_s29, 128  }
  0x2c   : > { %1168 = vsyncadd (%p1333_p12), %s302_s29, 4294967168 }
  0x2d   : > { %1170 = dma.done.wait (%p1284_p1), [#allocation8], 1024  }
  0x2e   : > { %1172 = vsyncadd (%p1284_p1), [#allocation8], 4294966272 }
  0x2f   : > { %1174 = dma.done.wait (%p1284_p1), [#allocation11], 8192  }
  0x30   : > { %1176 = vsyncadd (%p1284_p1), [#allocation11], 4294959104  ;;  %v396_v0 = vld [vmem:[#allocation9 + $0x18] sm:$0xff]  ;;  %v395_v1 = vld [vmem:[#allocation9 + $0x10] sm:$0xff]  ;;  %vm366_vm0 = vcmask 261120   ;;  %vm457_vm1 = vcmask 64512  }
  0x31   : > { %416 = vmatpush.msra.mxu1 %v396_v0  ;;  %v394_v2 = vld [vmem:[#allocation9 + $0x8] sm:$0xff]  ;;  %v393_v3 = vld [vmem:[#allocation9] sm:$0xff]  ;;  %v392_v4 = vld [vmem:[%s305_s9] sm:$0xff]  ;;  %s1212_s20 = smov 16   ;;  %s1213_s7 = smov 8   ;;  %vm729_vm2 = vcmask 130048  }
  0x32   : > { %v361_v5 = vld [vmem:[#allocation7 + $0x18] sm:$0xff]  ;;  %v360_v6 = vld [vmem:[#allocation7 + $0x10] sm:$0xff]  ;;  %v551_v7 = vld [vmem:[#allocation10 + $0x1e0] sm:$0xff]  ;;  %s1214_s27 = smov 24   ;;  %s887_s10 = sshll.u32 %s1195_s24, 3  ;;  %vm731_vm3 = vcmask 195584  }
  0x33   : > { %417 = vmatpush.msra.mxu1 %v395_v1  ;;  %382 = vmatpush.msra.mxu0 %v361_v5  ;;  %v552_v8 = vld [vmem:[#allocation10 + $0x1e8] sm:$0xff]  ;;  %v554_v10 = vld [vmem:[#allocation10 + $0x1f8] sm:$0xff]  ;;  %v547_v11 = vld [vmem:[#allocation10 + $0x1c0] sm:$0xff]  ;;  %s748_s17 = scalar_lea.hbm %s1453_s6, %s887_s10  ;;  %s349_s29 = scalar_lea.vmem [#allocation12], %s879_s30 }
  0x34   : > { %v359_v9 = vld [vmem:[#allocation7 + $0x8] sm:$0xff]  ;;  %555 = vmatpush.msra.mxu2 %v551_v7  ;;  %575 = vmatpush.msra.mxu3 %v552_v8  ;;  %v550_v13 = vld [vmem:[#allocation10 + $0x1d8] sm:$0xff]  ;;  %v358_v14 = vld [vmem:[#allocation7] sm:$0xff]  ;;  %s750_s9 = sshll.u32 %s349_s29, 4  ;;  %s752_s28 = sshll.u32 %s748_s17, 4  ;;  %s751_s9 = int_to_ptr.vmem [resolvable:$true] %s750_s9  ;;  %s753_s28 = int_to_ptr.hbm [resolvable:$true] %s752_s28 }
  0x35   : > { %418 = vmatpush.msra.mxu1 %v394_v2  ;;  %383 = vmatpush.msra.mxu0 %v360_v6  ;;  %v548_v12 = vld [vmem:[#allocation10 + $0x1c8] sm:$0xff]  ;;  %v553_v15 = vld [vmem:[#allocation10 + $0x1f0] sm:$0xff]  ;;  %v543_v21 = vld [vmem:[#allocation10 + $0x1a0] sm:$0xff]  ;;  %s736_s24 = scalar_lea.sflag [#allocation6], %s1363_s1  ;;  %s1127_s8 = sshra.s32 %s753_s28, 4  ;;  %s1128_s8 = int_to_ptr.hbm [resolvable:$true] %s1127_s8 }
  0x36   : > { %556 = vmatpush.msra.mxu2 %v547_v11  ;;  %576 = vmatpush.msra.mxu3 %v548_v12  ;;  %v549_v16 = vld [vmem:[#allocation10 + $0x1d0] sm:$0xff]  ;;  %v544_v22 = vld [vmem:[#allocation10 + $0x1a8] sm:$0xff]  ;;  %v546_v24 = vld [vmem:[#allocation10 + $0x1b8] sm:$0xff]  ;;  %s1129_s14 = scalar_lea.hbm %s1128_s8, 8  ;;  %p1134_p10 = scmp.lt.s32.totalorder %s1128_s8, %s1453_s6 }
  0x37   : > { %419 = vmatpush.msra.mxu1 %v393_v3  ;;  %384 = vmatpush.msra.mxu0 %v359_v9  ;;  %v991_v17 = vld [vmem:[%s1451_s4] ss:$0 sm:$0xff]  ;;  %v539_v25 = vld [vmem:[#allocation10 + $0x180] sm:$0xff]  ;;  %v540_v26 = vld [vmem:[#allocation10 + $0x188] sm:$0xff]  ;;  %p1130_p1 = scmp.ne.s32.totalorder %s1128_s8, %s1129_s14 }
  0x38   : > { %885 = vmatmul.msk.f32.vlgmr.msra.gmra.mxu1 %vm366_vm0, %v392_v4  ;;  %v545_v23 = vld [vmem:[#allocation10 + $0x1b0] sm:$0xff]  ;;  %557 = vmatpush.msra.mxu2 %v543_v21  ;;  %v542_v28 = vld [vmem:[#allocation10 + $0x198] sm:$0xff]  ;;  %v535_v29 = vld [vmem:[#allocation10 + $0x160] sm:$0xff] }
  0x39   : > { %615 = vmatpush.msrb.mxu1 %v554_v10  ;;  %385 = vmatpush.msra.mxu0 %v358_v14  ;;  %v541_v27 = vld [vmem:[#allocation10 + $0x190] sm:$0xff]  ;;  %v536_v30 = vld [vmem:[#allocation10 + $0x168] sm:$0xff]  ;;  %v538_v32 = vld [vmem:[#allocation10 + $0x178] sm:$0xff]  ;;  %p1131_p3 = pnand %p1130_p1, %p1341_p4 }
  0x3a   : > { %884 = vmatmul.msk.f32.vlgmr.msra.gmra.mxu0 %vm366_vm0, %v392_v4  ;;  %577 = vmatpush.msra.mxu3 %v544_v22  ;;  %v537_v31 = vld [vmem:[#allocation10 + $0x170] sm:$0xff]  ;;  %v531_v33 = vld [vmem:[#allocation10 + $0x140] sm:$0xff]  ;;  %v532_v34 = vld [vmem:[#allocation10 + $0x148] sm:$0xff] }
  0x3b   : > { %616 = vmatpush.msrb.mxu1 %v550_v13  ;;  %595 = vmatpush.msrb.mxu0 %v553_v15  ;;  %v533_v35 = vld [vmem:[#allocation10 + $0x150] sm:$0xff]  ;;  %v534_v36 = vld [vmem:[#allocation10 + $0x158] sm:$0xff]  ;;  %v527_v37 = vld [vmem:[#allocation10 + $0x120] sm:$0xff]  ;;  %p1132_p9 = pneg %p1131_p3 }
  0x3c   : > { %558 = vmatpush.msra.mxu2 %v539_v25  ;;  %578 = vmatpush.msra.mxu3 %v540_v26  ;;  %v528_v38 = vld [vmem:[#allocation10 + $0x128] sm:$0xff]  ;;  %v529_v39 = vld [vmem:[#allocation10 + $0x130] sm:$0xff]  ;;  %v530_v40 = vld [vmem:[#allocation10 + $0x138] sm:$0xff] }
  0x3d   : > { %596 = vmatpush.msrb.mxu0 %v549_v16  ;;  %617 = vmatpush.msrb.mxu1 %v546_v24  ;;  %v523_v41 = vld [vmem:[#allocation10 + $0x100] sm:$0xff]  ;;  %v524_v42 = vld [vmem:[#allocation10 + $0x108] sm:$0xff]  ;;  %v525_v43 = vld [vmem:[#allocation10 + $0x110] sm:$0xff] }
  0x3e   : > { %559 = vmatpush.msra.mxu2 %v535_v29  ;;  %579 = vmatpush.msra.mxu3 %v536_v30  ;;  %v526_v44 = vld [vmem:[#allocation10 + $0x118] sm:$0xff]  ;;  %v519_v45 = vld [vmem:[#allocation10 + $0xe0] sm:$0xff]  ;;  %v520_v46 = vld [vmem:[#allocation10 + $0xe8] sm:$0xff] }
  0x3f   : > { %597 = vmatpush.msrb.mxu0 %v545_v23  ;;  %618 = vmatpush.msrb.mxu1 %v542_v28  ;;  %v521_v47 = vld [vmem:[#allocation10 + $0xf0] sm:$0xff]  ;;  %v522_v48 = vld [vmem:[#allocation10 + $0xf8] sm:$0xff]  ;;  %v515_v49 = vld [vmem:[#allocation10 + $0xc0] sm:$0xff] }
  0x40   : > { %560 = vmatpush.msra.mxu2 %v531_v33  ;;  %580 = vmatpush.msra.mxu3 %v532_v34  ;;  %v516_v50 = vld [vmem:[#allocation10 + $0xc8] sm:$0xff]  ;;  %v517_v51 = vld [vmem:[#allocation10 + $0xd0] sm:$0xff]  ;;  %v518_v52 = vld [vmem:[#allocation10 + $0xd8] sm:$0xff] }
  0x41   : > { %598 = vmatpush.msrb.mxu0 %v541_v27  ;;  %619 = vmatpush.msrb.mxu1 %v538_v32  ;;  %v511_v53 = vld [vmem:[#allocation10 + $0xa0] sm:$0xff]  ;;  %v512_v54 = vld [vmem:[#allocation10 + $0xa8] sm:$0xff]  ;;  %v513_v55 = vld [vmem:[#allocation10 + $0xb0] sm:$0xff] }
  0x42   : > { %561 = vmatpush.msra.mxu2 %v527_v37  ;;  %581 = vmatpush.msra.mxu3 %v528_v38  ;;  %v514_v56 = vld [vmem:[#allocation10 + $0xb8] sm:$0xff]  ;;  %v507_v57 = vld [vmem:[#allocation10 + $0x80] sm:$0xff]  ;;  %v508_v58 = vld [vmem:[#allocation10 + $0x88] sm:$0xff] }
  0x43   : > { %599 = vmatpush.msrb.mxu0 %v537_v31  ;;  %620 = vmatpush.msrb.mxu1 %v534_v36  ;;  %v509_v59 = vld [vmem:[#allocation10 + $0x90] sm:$0xff]  ;;  %v510_v60 = vld [vmem:[#allocation10 + $0x98] sm:$0xff]  ;;  %v503_v61 = vld [vmem:[#allocation10 + $0x60] sm:$0xff] }
  0x44   : > { %562 = vmatpush.msra.mxu2 %v523_v41  ;;  %582 = vmatpush.msra.mxu3 %v524_v42  ;;  %v504_v62 = vld [vmem:[#allocation10 + $0x68] sm:$0xff]  ;;  %v505_v63 = vld [vmem:[#allocation10 + $0x70] sm:$0xff]  ;;  %v506_v0 = vld [vmem:[#allocation10 + $0x78] sm:$0xff] }
  0x45   : > { %600 = vmatpush.msrb.mxu0 %v533_v35  ;;  %621 = vmatpush.msrb.mxu1 %v530_v40  ;;  %v992_v2 = vld [vmem:[%s1449_s2] ss:$0 sm:$0xff]  ;;  %v499_v3 = vld [vmem:[#allocation10 + $0x40] sm:$0xff]  ;;  %v500_v4 = vld [vmem:[#allocation10 + $0x48] sm:$0xff] }
  0x46   : > { %563 = vmatpush.msra.mxu2 %v519_v45  ;;  %583 = vmatpush.msra.mxu3 %v520_v46  ;;  %v501_v5 = vld [vmem:[#allocation10 + $0x50] sm:$0xff]  ;;  %v502_v6 = vld [vmem:[#allocation10 + $0x58] sm:$0xff]  ;;  %v495_v8 = vld [vmem:[#allocation10 + $0x20] sm:$0xff] }
  0x47   : > { %601 = vmatpush.msrb.mxu0 %v529_v39  ;;  %622 = vmatpush.msrb.mxu1 %v526_v44  ;;  %v496_v9 = vld [vmem:[#allocation10 + $0x28] sm:$0xff]  ;;  %v497_v10 = vld [vmem:[#allocation10 + $0x30] sm:$0xff]  ;;  %v498_v12 = vld [vmem:[#allocation10 + $0x38] sm:$0xff] }
  0x48   : > { %564 = vmatpush.msra.mxu2 %v515_v49  ;;  %584 = vmatpush.msra.mxu3 %v516_v50  ;;  %v491_v13 = vld [vmem:[#allocation10] sm:$0xff]  ;;  %v492_v14 = vld [vmem:[#allocation10 + $0x8] sm:$0xff]  ;;  %v493_v15 = vld [vmem:[#allocation10 + $0x10] sm:$0xff] }
  0x49   : > { %602 = vmatpush.msrb.mxu0 %v525_v43  ;;  %623 = vmatpush.msrb.mxu1 %v522_v48  ;;  %v494_v16 = vld [vmem:[#allocation10 + $0x18] sm:$0xff] }
  0x4a   : > { %565 = vmatpush.msra.mxu2 %v511_v53  ;;  %585 = vmatpush.msra.mxu3 %v512_v54 }
  0x4b   : > { %603 = vmatpush.msrb.mxu0 %v521_v47  ;;  %624 = vmatpush.msrb.mxu1 %v518_v52 }
  0x4c   : > { %566 = vmatpush.msra.mxu2 %v507_v57  ;;  %586 = vmatpush.msra.mxu3 %v508_v58 }
  0x4d   : > { %604 = vmatpush.msrb.mxu0 %v517_v51  ;;  %625 = vmatpush.msrb.mxu1 %v514_v56 }
  0x4e   : > { %567 = vmatpush.msra.mxu2 %v503_v61  ;;  %587 = vmatpush.msra.mxu3 %v504_v62 }
  0x4f   : > { %605 = vmatpush.msrb.mxu0 %v513_v55  ;;  %626 = vmatpush.msrb.mxu1 %v510_v60 }
  0x50   : > { %568 = vmatpush.msra.mxu2 %v499_v3  ;;  %588 = vmatpush.msra.mxu3 %v500_v4 }
  0x51   : > { %606 = vmatpush.msrb.mxu0 %v509_v59  ;;  %627 = vmatpush.msrb.mxu1 %v506_v0 }
  0x52   : > { %569 = vmatpush.msra.mxu2 %v495_v8  ;;  %589 = vmatpush.msra.mxu3 %v496_v9 }
  0x53   : > { %607 = vmatpush.msrb.mxu0 %v505_v63  ;;  %628 = vmatpush.msrb.mxu1 %v502_v6 }
  0x54   : > { %570 = vmatpush.msra.mxu2 %v491_v13  ;;  %590 = vmatpush.msra.mxu3 %v492_v14 }
  0x55   : > { %608 = vmatpush.msrb.mxu0 %v501_v5  ;;  %629 = vmatpush.msrb.mxu1 %v498_v12 }
  0x57   : > { %609 = vmatpush.msrb.mxu0 %v497_v10  ;;  %630 = vmatpush.msrb.mxu1 %v494_v16 }
  0x59   : > { %610 = vmatpush.msrb.mxu0 %v493_v15 }
  0xb5   : > { %v421_v18 = vpop.f32.mrf.mxu1 }
  0xb6   : > { %v422_v19 = vadd.f32 %v991_v17, %v421_v18 }
  0xb7   : > { %v387_v1 = vpop.f32.mrf.mxu0 }
  0xb8   : > { %v424_v20 = vmax.f32 %v422_v19, 0.0  ;;  %v388_v7 = vadd.f32 %v992_v2, %v387_v1 }
  0xba   : > { %425 = vxpose.xlu0.b32.start.end [1/1] (short) %v424_v20, 128  ;;  %v390_v11 = vmax.f32 %v388_v7, 0.0 }
  0xbc   : > { %571 = vmatmul.f32.vlgmr.msra.gmra.mxu2 %v390_v11  ;;  %591 = vmatmul.f32.vlgmr.msra.gmra.mxu3 %v390_v11 }
  0xbd   : > { %611 = vmatmul.f32.vlgmr.msrb.gmra.mxu0 %v390_v11  ;;  %631 = vmatmul.f32.vlgmr.msrb.gmra.mxu1 %v390_v11 }
 0x13a   : > { %v612_v51 = vpop.f32.mrf.mxu0  ;;  %v632_v52 = vpop.f32.mrf.mxu1 }
 0x13f   : > { %v572_v48 = vpop.f32.mrf.mxu2  ;;  %v592_v49 = vpop.f32.mrf.mxu3 }
 0x15e   : > { %v441_v17 = vpop.trf.xlu0 }
 0x15f   : > { %458 = vst.msk [vmem:[#allocation3] sm:$0xff] %vm457_vm1, %v441_v17 }
 0x166   : > { %v442_v18 = vpop.trf.xlu0  ;;  %v475_v50 = vld [vmem:[#allocation3] sm:$0xff] }
 0x167   : > { %459 = vst.msk [vmem:[#allocation3 + $0x8] sm:$0xff] %vm457_vm1, %v442_v18 }
 0x16e   : > { %v443_v19 = vpop.trf.xlu0  ;;  %v476_v47 = vld [vmem:[#allocation3 + $0x8] sm:$0xff] }
 0x16f   : > { %460 = vst.msk [vmem:[#allocation3 + $0x10] sm:$0xff] %vm457_vm1, %v443_v19 }
 0x176   : > { %v444_v20 = vpop.trf.xlu0  ;;  %v477_v46 = vld [vmem:[#allocation3 + $0x10] sm:$0xff] }
 0x177   : > { %461 = vst.msk [vmem:[#allocation3 + $0x18] sm:$0xff] %vm457_vm1, %v444_v20 }
 0x17e   : > { %v445_v21 = vpop.trf.xlu0  ;;  %v478_v45 = vld [vmem:[#allocation3 + $0x18] sm:$0xff] }
 0x17f   : > { %462 = vst.msk [vmem:[#allocation3 + $0x20] sm:$0xff] %vm457_vm1, %v445_v21 }
 0x186   : > { %v446_v22 = vpop.trf.xlu0  ;;  %v479_v44 = vld [vmem:[#allocation3 + $0x20] sm:$0xff] }
 0x187   : > { %463 = vst.msk [vmem:[#allocation3 + $0x28] sm:$0xff] %vm457_vm1, %v446_v22 }
 0x18e   : > { %v447_v23 = vpop.trf.xlu0  ;;  %v480_v43 = vld [vmem:[#allocation3 + $0x28] sm:$0xff] }
 0x18f   : > { %464 = vst.msk [vmem:[#allocation3 + $0x30] sm:$0xff] %vm457_vm1, %v447_v23 }
 0x196   : > { %v448_v24 = vpop.trf.xlu0  ;;  %v481_v42 = vld [vmem:[#allocation3 + $0x30] sm:$0xff] }
 0x197   : > { %465 = vst.msk [vmem:[#allocation3 + $0x38] sm:$0xff] %vm457_vm1, %v448_v24 }
 0x19e   : > { %v449_v25 = vpop.trf.xlu0  ;;  %v482_v41 = vld [vmem:[#allocation3 + $0x38] sm:$0xff] }
 0x19f   : > { %466 = vst.msk [vmem:[#allocation3 + $0x40] sm:$0xff] %vm457_vm1, %v449_v25 }
 0x1a6   : > { %v450_v26 = vpop.trf.xlu0  ;;  %v483_v40 = vld [vmem:[#allocation3 + $0x40] sm:$0xff] }
 0x1a7   : > { %467 = vst.msk [vmem:[#allocation3 + $0x48] sm:$0xff] %vm457_vm1, %v450_v26 }
 0x1ae   : > { %v451_v27 = vpop.trf.xlu0  ;;  %v484_v39 = vld [vmem:[#allocation3 + $0x48] sm:$0xff] }
 0x1af   : > { %468 = vst.msk [vmem:[#allocation3 + $0x50] sm:$0xff] %vm457_vm1, %v451_v27 }
 0x1b6   : > { %v452_v28 = vpop.trf.xlu0  ;;  %v485_v38 = vld [vmem:[#allocation3 + $0x50] sm:$0xff] }
 0x1b7   : > { %469 = vst.msk [vmem:[#allocation3 + $0x58] sm:$0xff] %vm457_vm1, %v452_v28 }
 0x1be   : > { %v453_v29 = vpop.trf.xlu0  ;;  %v486_v37 = vld [vmem:[#allocation3 + $0x58] sm:$0xff] }
 0x1bf   : > { %470 = vst.msk [vmem:[#allocation3 + $0x60] sm:$0xff] %vm457_vm1, %v453_v29 }
 0x1c6   : > { %v454_v30 = vpop.trf.xlu0  ;;  %v487_v36 = vld [vmem:[#allocation3 + $0x60] sm:$0xff] }
 0x1c7   : > { %471 = vst.msk [vmem:[#allocation3 + $0x68] sm:$0xff] %vm457_vm1, %v454_v30 }
 0x1ce   : > { %v455_v31 = vpop.trf.xlu0  ;;  %v488_v35 = vld [vmem:[#allocation3 + $0x68] sm:$0xff] }
 0x1cf   : > { %472 = vst.msk [vmem:[#allocation3 + $0x70] sm:$0xff] %vm457_vm1, %v455_v31 }
 0x1d6   : > { %v456_v32 = vpop.trf.xlu0  ;;  %v489_v34 = vld [vmem:[#allocation3 + $0x70] sm:$0xff] }
 0x1d7   : > { %473 = vst.msk [vmem:[#allocation3 + $0x78] sm:$0xff] %vm457_vm1, %v456_v32 }
 0x1de   : > { %v490_v33 = vld [vmem:[#allocation3 + $0x78] sm:$0xff] }
 0x1df   : > { %635 = vmatpush.msrb.mxu2 %v490_v33  ;;  %655 = vmatpush.msrb.mxu3 %v490_v33 }
 0x1e0   : > { %675 = vmatpush.msra.mxu0 %v490_v33  ;;  %695 = vmatpush.msra.mxu1 %v490_v33 }
 0x1e1   : > { %636 = vmatpush.msrb.mxu2 %v489_v34  ;;  %656 = vmatpush.msrb.mxu3 %v489_v34 }
 0x1e2   : > { %676 = vmatpush.msra.mxu0 %v489_v34  ;;  %696 = vmatpush.msra.mxu1 %v489_v34 }
 0x1e3   : > { %637 = vmatpush.msrb.mxu2 %v488_v35  ;;  %657 = vmatpush.msrb.mxu3 %v488_v35 }
 0x1e4   : > { %677 = vmatpush.msra.mxu0 %v488_v35  ;;  %697 = vmatpush.msra.mxu1 %v488_v35 }
 0x1e5   : > { %638 = vmatpush.msrb.mxu2 %v487_v36  ;;  %658 = vmatpush.msrb.mxu3 %v487_v36 }
 0x1e6   : > { %678 = vmatpush.msra.mxu0 %v487_v36  ;;  %698 = vmatpush.msra.mxu1 %v487_v36 }
 0x1e7   : > { %639 = vmatpush.msrb.mxu2 %v486_v37  ;;  %659 = vmatpush.msrb.mxu3 %v486_v37 }
 0x1e8   : > { %679 = vmatpush.msra.mxu0 %v486_v37  ;;  %699 = vmatpush.msra.mxu1 %v486_v37 }
 0x1e9   : > { %640 = vmatpush.msrb.mxu2 %v485_v38  ;;  %660 = vmatpush.msrb.mxu3 %v485_v38 }
 0x1ea   : > { %680 = vmatpush.msra.mxu0 %v485_v38  ;;  %700 = vmatpush.msra.mxu1 %v485_v38 }
 0x1eb   : > { %641 = vmatpush.msrb.mxu2 %v484_v39  ;;  %661 = vmatpush.msrb.mxu3 %v484_v39 }
 0x1ec   : > { %681 = vmatpush.msra.mxu0 %v484_v39  ;;  %701 = vmatpush.msra.mxu1 %v484_v39 }
 0x1ed   : > { %642 = vmatpush.msrb.mxu2 %v483_v40  ;;  %662 = vmatpush.msrb.mxu3 %v483_v40 }
 0x1ee   : > { %682 = vmatpush.msra.mxu0 %v483_v40  ;;  %702 = vmatpush.msra.mxu1 %v483_v40 }
 0x1ef   : > { %643 = vmatpush.msrb.mxu2 %v482_v41  ;;  %663 = vmatpush.msrb.mxu3 %v482_v41 }
 0x1f0   : > { %683 = vmatpush.msra.mxu0 %v482_v41  ;;  %703 = vmatpush.msra.mxu1 %v482_v41 }
 0x1f1   : > { %644 = vmatpush.msrb.mxu2 %v481_v42  ;;  %664 = vmatpush.msrb.mxu3 %v481_v42 }
 0x1f2   : > { %684 = vmatpush.msra.mxu0 %v481_v42  ;;  %704 = vmatpush.msra.mxu1 %v481_v42 }
 0x1f3   : > { %645 = vmatpush.msrb.mxu2 %v480_v43  ;;  %665 = vmatpush.msrb.mxu3 %v480_v43 }
 0x1f4   : > { %685 = vmatpush.msra.mxu0 %v480_v43  ;;  %705 = vmatpush.msra.mxu1 %v480_v43 }
 0x1f5   : > { %646 = vmatpush.msrb.mxu2 %v479_v44  ;;  %666 = vmatpush.msrb.mxu3 %v479_v44 }
 0x1f6   : > { %686 = vmatpush.msra.mxu0 %v479_v44  ;;  %706 = vmatpush.msra.mxu1 %v479_v44 }
 0x1f7   : > { %647 = vmatpush.msrb.mxu2 %v478_v45  ;;  %667 = vmatpush.msrb.mxu3 %v478_v45 }
 0x1f8   : > { %687 = vmatpush.msra.mxu0 %v478_v45  ;;  %707 = vmatpush.msra.mxu1 %v478_v45 }
 0x1f9   : > { %648 = vmatpush.msrb.mxu2 %v477_v46  ;;  %668 = vmatpush.msrb.mxu3 %v477_v46 }
 0x1fa   : > { %688 = vmatpush.msra.mxu0 %v477_v46  ;;  %708 = vmatpush.msra.mxu1 %v477_v46 }
 0x1fb   : > { %649 = vmatpush.msrb.mxu2 %v476_v47  ;;  %669 = vmatpush.msrb.mxu3 %v476_v47 }
 0x1fc   : > { %689 = vmatpush.msra.mxu0 %v476_v47  ;;  %709 = vmatpush.msra.mxu1 %v476_v47 }
 0x1fd   : > { %650 = vmatpush.msrb.mxu2 %v475_v50  ;;  %670 = vmatpush.msrb.mxu3 %v475_v50 }
 0x1fe   : > { %690 = vmatpush.msra.mxu0 %v475_v50  ;;  %710 = vmatpush.msra.mxu1 %v475_v50 }
 0x1ff   : > { %651 = vmatmul.f32.vlgmr.msrb.gmra.mxu2 %v572_v48  ;;  %671 = vmatmul.f32.vlgmr.msrb.gmra.mxu3 %v592_v49 }
 0x200   : > { %691 = vmatmul.f32.vlgmr.msra.gmra.mxu0 %v612_v51  ;;  %711 = vmatmul.f32.vlgmr.msra.gmra.mxu1 %v632_v52 }
 0x27d   : > { %v692_v53 = vpop.f32.mrf.mxu0  ;;  %v712_v55 = vpop.f32.mrf.mxu1 }
 0x27e   : > { %720 = vrot.lane.b32.xlu1 %v692_v53, %s1212_s20  ;;  %s1133_s20 = scalar_lea.hbm %s1453_s6, 16 }
 0x27f   : > { %p1135_p11 = scmp.lt.s32.totalorder %s1133_s20, %s1129_s14 }
 0x281   : > { %p1136_p12 = por %p1135_p11, %p1134_p10 }
 0x282   : > { %v672_v54 = vpop.f32.mrf.mxu3  ;;  %v652_v57 = vpop.f32.mrf.mxu2 }
 0x283   : > { %716 = vrot.lane.b32.xlu0 %v672_v54, %s1213_s7  ;;  %p1137_p13 = pnand %p1136_p12, %p1132_p9 }
 0x286   : > { %724 = vrot.lane.b32.xlu1 %v712_v55, %s1214_s27 }
 0x2f0   : > { %v721_v56 = vpop.permute.xlu1 %720 }
 0x2f5   : > { %v717_v58 = vpop.permute.xlu0 %716 }
 0x2f6   : > { %v728_v59 = vsel %vm457_vm1, %v652_v57, %v717_v58 }
 0x2f7   : > { %v730_v60 = vsel %vm729_vm2, %v728_v59, %v721_v56 }
 0x2f8   : > { %v725_v61 = vpop.permute.xlu1 %724 }
 0x2f9   : > { %v732_v62 = vsel %vm731_vm3, %v730_v60, %v725_v61 }
 0x2fa   : > { %734 = vst.msk [vmem:[%s349_s29] sm:$0xff] %vm366_vm0, %v732_v62 }
 0x2fb   : > { %1140 = shalt.err (!%p1137_p13)
}
 0x2fc   : > { %904 = dma.vmem_to_hbm [thread:$0]  (%p1341_p4), %s751_s9, 128, %s753_s28, %s736_s24  }
 0x2fd PF: > { %s764_s1 = sand.u32 1, %s1183_s21   ;;  %p921_p0 = pnand %p875_p6, %p1349_p7 }
 0x2fe   : > { %s765_s10 = scalar_lea.sflag [#allocation6], %s764_s1 }
 0x2ff   : > { %p922_p2 = pneg %p921_p0 }
 0x301   : > { %1178 = dma.done.wait (%p922_p2), %s765_s10, 128  }
 0x302   : > { %1180 = vsyncadd (%p922_p2), %s765_s10, 4294967168  ;;  %s24_s26 = sadd.s32 1, %s1203_s26   ;;  %s1463_s21 = smov %s1187_s22 }
 0x303   : > { %p21_p5 = scmp.ge.s32.totalorder %s24_s26, 4   ;;  %s1464_s22 = smov %s1191_s23 }
 0x304   : > { %s1465_s23 = smov %s1347_s18  ;;  %s1466_s24 = smov %s1199_s25 }
 0x305   : > { %s1467_s25 = smov %s1469_s13  ;;  %23 = sbr.rel (!%p21_p5) target bundleno = 10 (0xa), region = 107 }
 0x30a   :  { %771 = vsyncpa [#allocation5], 1 }
 0x30b   :  { %773 = vsyncpa [#allocation5 + $0x1], 1 }
 0x30c   :  { %774 = vsyncpa [#allocation8], 1 }
 0x30d   :  { %775 = vsyncpa [#allocation11], 1 }
 0x30e   :  { %776 = vsyncpa [#allocation6], 1 }
 0x30f   :  { %778 = vsyncpa [#allocation6 + $0x1], 1 }

// kernel: tpu_custom_call.1
= control target key start
LH: loop header
LB: loop body
LE: loop exit
PB: predicated region body
PF: predicated region fallthrough
CT: control target
= control target key end

     0   :  { %s1447_s0 = inlined_call_operand.hbm [shape: f32[2,8,32], index: 0, kind: input, shape index: {}]   ;;  %s1448_s1 = inlined_call_operand.hbm [shape: f32[32,128], index: 1, kind: input, shape index: {}]   ;;  %s1449_s2 = inlined_call_operand.vmem [shape: f32[1,128], index: 2, kind: input, shape index: {}]   ;;  %s1450_s3 = inlined_call_operand.hbm [shape: f32[32,128], index: 3, kind: input, shape index: {}]   ;;  %s1451_s4 = inlined_call_operand.vmem [shape: f32[1,128], index: 4, kind: input, shape index: {}]   ;;  %s1452_s5 = inlined_call_operand.hbm [shape: f32[128,512], index: 5, kind: input, shape index: {}]   ;;  %s1453_s6 = inlined_call_operand.hbm [shape: f32[2,8,32], index: 6, kind: output, shape index: {}]  }
   0x1   :  { %1454 = sst [smem:[#allocation17_spill]] %s1448_s1 }
   0x2   :  { %11 = vsyncpa [#allocation5], 0 }
   0x3   :  { %13 = vsyncpa [#allocation5 + $0x1], 0 }
   0x4   :  { %14 = vsyncpa [#allocation8], 0 }
   0x5   :  { %15 = vsyncpa [#allocation11], 0 }
   0x6   :  { %16 = vsyncpa [#allocation6], 0 }
   0x7   :  { %18 = vsyncpa [#allocation6 + $0x1], 0  ;;  %s1250_s21 = smov 0   ;;  %s1252_s22 = smov 0  }
   0x8   :  { %s1254_s23 = smov 0   ;;  %s1256_s24 = smov 0  }
   0x9   :  { %s1258_s25 = smov 0   ;;  %s1260_s26 = smov 0  }
   0xa LB: > { %s869_s27 = sadd.s32 4294967295, %s1203_s26   ;;  %p871_p0 = scmp.ge.s32.totalorder %s1203_s26, 1  ;;  %s1203_s26 = sphi %s1260_s26, %s24_s26   ;;  %s1199_s25 = sphi %s1258_s25, %s1467_s25   ;;  %s1195_s24 = sphi %s1256_s24, %s1466_s24   ;;  %s1191_s23 = sphi %s1254_s23, %s1465_s23   ;;  %s1187_s22 = sphi %s1252_s22, %s1464_s22   ;;  %s1183_s21 = sphi %s1250_s21, %s1463_s21  }
   0xb   : > { %p1284_p1 = scmp.eq.s32.totalorder %s869_s27, 0  ;;  %p214_p2 = scmp.lt.s32.totalorder %s1203_s26, 3 }
   0xc   : > { %s1456_s1 = sld [smem:[#allocation17_spill]]  ;;  %s1205_s9 = smov [#allocation7]  }
   0xd   : > { %p1292_p3 = pnand %p871_p0, %p214_p2  ;;  %s227_s10 = sshll.u32 %s1205_s9, 4  ;;  %s228_s10 = int_to_ptr.vmem [resolvable:$true] %s227_s10 }
   0xe   : > { %p875_p6 = scmp.ge.s32.totalorder %s1203_s26, 2  ;;  %s242_s14 = sshll.u32 %s1450_s3, 4  ;;  %s243_s14 = int_to_ptr.hbm [resolvable:$true] %s242_s14 }
   0xf   : > { %p906_p4 = pneg %p1292_p3  ;;  %s1206_s15 = smov 128  }
  0x10   : > { %s1207_s16 = smov 8   ;;  %s1208_s17 = smov [#allocation9]  }
  0x11   : > { %p1300_p5 = pnand %p906_p4, %p1284_p1  ;;  %s244_s18 = sshll.u32 %s1208_s17, 4  ;;  %s245_s18 = int_to_ptr.vmem [resolvable:$true] %s244_s18 }
  0x12   : > { %s225_s7 = sshll.u32 %s1456_s1, 4  ;;  %s262_s29 = sshll.u32 %s1452_s5, 4  ;;  %s226_s7 = int_to_ptr.hbm [resolvable:$true] %s225_s7  ;;  %s263_s29 = int_to_ptr.hbm [resolvable:$true] %s262_s29 }
  0x13   : > { %909 = dma.hbm_to_vmem [thread:$0]  (!%p1300_p5), %s226_s7, 512, %s228_s10, [#allocation8], %s1206_s15, %s1206_s15, %s1207_s16  }
  0x14   : > { %912 = dma.hbm_to_vmem [thread:$0]  (!%p1300_p5), %s243_s14, 512, %s245_s18, [#allocation8], %s1206_s15, %s1206_s15, %s1207_s16  }
  0x15   : > { %s1209_s30 = smov [#allocation10]   ;;  %s1210_s7 = smov 512  }
  0x16   : > { %s264_s9 = sshll.u32 %s1209_s30, 4  ;;  %s1211_s10 = smov 32   ;;  %s265_s9 = int_to_ptr.vmem [resolvable:$true] %s264_s9 }
  0x17   : > { %915 = dma.hbm_to_vmem [thread:$0]  (!%p1300_p5), %s263_s29, 8192, %s265_s9, [#allocation11], %s1210_s7, %s1210_s7, %s1211_s10  }
  0x18   : > { %s870_s12 = sadd.s32 4294967294, %s1203_s26   ;;  %s43_s13 = sadd.s32 1, %s1199_s25 }
  0x19   : > { %s50_s17 = sadd.s32 1, %s1191_s23  ;;  %p45_p7 = scmp.ge.s32.totalorder %s43_s13, 2 }
  0x1a   : > { %p57_p8 = scmp.ne.s32.totalorder %s1191_s23, %s1187_s22  ;;  %p58_p9 = scmp.eq.s32.totalorder %s1203_s26, 0 }
  0x1b   : > { %p63_p10 = scmp.ne.s32.totalorder %s1187_s22, %s1183_s21  ;;  %s1469_s13 = smov (%p45_p7, %s43_s13), 0 }
  0x1c   : > { %p1327_p11 = por %p58_p9, %p57_p8  ;;  %s47_s15 = ssub.s32 %s1199_s25, %s1469_s13 }
  0x1d   : > { %p1333_p12 = por %p1284_p1, %p63_p10  ;;  %p201_p13 = scmp.eq.s32.totalorder %s869_s27, 1 }
  0x1e   : > { %p48_p0 = scmp.eq.s32.totalorder %s47_s15, 0  ;;  %p207_p2 = scmp.eq.s32.totalorder %s870_s12, 1 }
  0x1f   : > { %p1341_p4 = por %p201_p13, %p57_p8  ;;  %p927_p5 = scmp.lt.s32.totalorder %s1203_s26, 2 }
  0x20   : > { %s1347_s18 = scalar_select %p48_p0, %s1191_s23, %s50_s17  }
  0x21   : > { %p1349_p7 = por %p207_p2, %p63_p10  ;;  %s278_s20 = sand.u32 1, %s1191_s23  }
  0x22   : > { %s876_s29 = sshll.u32 %s278_s20, 3  ;;  %s877_s30 = sshll.u32 %s1199_s25, 3 }
  0x23   : > { %s286_s27 = scalar_lea.hbm %s1447_s0, %s877_s30  ;;  %s282_s10 = scalar_lea.vmem [#allocation4], %s876_s29 }
  0x24   : > { %s290_s12 = sshll.u32 %s282_s10, 4  ;;  %s288_s15 = sshll.u32 %s286_s27, 4  ;;  %s291_s12 = int_to_ptr.vmem [resolvable:$true] %s290_s12  ;;  %s289_s15 = int_to_ptr.hbm [resolvable:$true] %s288_s15 }
  0x25   : > { %p917_p8 = pnand %p927_p5, %p1327_p11  ;;  %s279_s17 = scalar_lea.sflag [#allocation5], %s278_s20 }
  0x26   : > { %299 = sbr.rel (%p1292_p3) target bundleno = 765 (0x2fd), region = 44  ;;  %s1363_s1 = sand.u32 (!%p1292_p3), 1, %s1187_s22  }
  0x27   : > { %919 = dma.hbm_to_vmem [thread:$0]  (!%p917_p8), %s289_s15, 128, %s291_s12, %s279_s17  }
  0x28   : > { %s879_s30 = sshll.u32 (!%p1292_p3), %s1363_s1, 3  ;;  %s302_s29 = scalar_lea.sflag (!%p1292_p3), [#allocation5], %s1363_s1 }
  0x29   : > { %s305_s9 = scalar_lea.vmem (!%p1292_p3), [#allocation4], %s879_s30 }
  0x2b   : > { %1166 = dma.done.wait (%p1333_p12), %s302_s29, 128  }
  0x2c   : > { %1168 = vsyncadd (%p1333_p12), %s302_s29, 4294967168 }
  0x2d   : > { %1170 = dma.done.wait (%p1284_p1), [#allocation8], 1024  }
  0x2e   : > { %1172 = vsyncadd (%p1284_p1), [#allocation8], 4294966272 }
  0x2f   : > { %1174 = dma.done.wait (%p1284_p1), [#allocation11], 8192  }
  0x30   : > { %1176 = vsyncadd (%p1284_p1), [#allocation11], 4294959104  ;;  %v396_v0 = vld [vmem:[#allocation9 + $0x18] sm:$0xff]  ;;  %v395_v1 = vld [vmem:[#allocation9 + $0x10] sm:$0xff]  ;;  %vm366_vm0 = vcmask 261120   ;;  %vm457_vm1 = vcmask 64512  }
  0x31   : > { %416 = vmatpush.msra.mxu1 %v396_v0  ;;  %v394_v2 = vld [vmem:[#allocation9 + $0x8] sm:$0xff]  ;;  %v393_v3 = vld [vmem:[#allocation9] sm:$0xff]  ;;  %v392_v4 = vld [vmem:[%s305_s9] sm:$0xff]  ;;  %s1212_s20 = smov 16   ;;  %s1213_s7 = smov 8   ;;  %vm729_vm2 = vcmask 130048  }
  0x32   : > { %v361_v5 = vld [vmem:[#allocation7 + $0x18] sm:$0xff]  ;;  %v360_v6 = vld [vmem:[#allocation7 + $0x10] sm:$0xff]  ;;  %v551_v7 = vld [vmem:[#allocation10 + $0x1e0] sm:$0xff]  ;;  %s1214_s27 = smov 24   ;;  %s887_s10 = sshll.u32 %s1195_s24, 3  ;;  %vm731_vm3 = vcmask 195584  }
  0x33   : > { %417 = vmatpush.msra.mxu1 %v395_v1  ;;  %382 = vmatpush.msra.mxu0 %v361_v5  ;;  %v552_v8 = vld [vmem:[#allocation10 + $0x1e8] sm:$0xff]  ;;  %v554_v10 = vld [vmem:[#allocation10 + $0x1f8] sm:$0xff]  ;;  %v547_v11 = vld [vmem:[#allocation10 + $0x1c0] sm:$0xff]  ;;  %s748_s17 = scalar_lea.hbm %s1453_s6, %s887_s10  ;;  %s349_s29 = scalar_lea.vmem [#allocation12], %s879_s30 }
  0x34   : > { %v359_v9 = vld [vmem:[#allocation7 + $0x8] sm:$0xff]  ;;  %555 = vmatpush.msra.mxu2 %v551_v7  ;;  %575 = vmatpush.msra.mxu3 %v552_v8  ;;  %v550_v13 = vld [vmem:[#allocation10 + $0x1d8] sm:$0xff]  ;;  %v358_v14 = vld [vmem:[#allocation7] sm:$0xff]  ;;  %s750_s9 = sshll.u32 %s349_s29, 4  ;;  %s752_s28 = sshll.u32 %s748_s17, 4  ;;  %s751_s9 = int_to_ptr.vmem [resolvable:$true] %s750_s9  ;;  %s753_s28 = int_to_ptr.hbm [resolvable:$true] %s752_s28 }
  0x35   : > { %418 = vmatpush.msra.mxu1 %v394_v2  ;;  %383 = vmatpush.msra.mxu0 %v360_v6  ;;  %v548_v12 = vld [vmem:[#allocation10 + $0x1c8] sm:$0xff]  ;;  %v553_v15 = vld [vmem:[#allocation10 + $0x1f0] sm:$0xff]  ;;  %v543_v21 = vld [vmem:[#allocation10 + $0x1a0] sm:$0xff]  ;;  %s736_s24 = scalar_lea.sflag [#allocation6], %s1363_s1  ;;  %s1127_s8 = sshra.s32 %s753_s28, 4  ;;  %s1128_s8 = int_to_ptr.hbm [resolvable:$true] %s1127_s8 }
  0x36   : > { %556 = vmatpush.msra.mxu2 %v547_v11  ;;  %576 = vmatpush.msra.mxu3 %v548_v12  ;;  %v549_v16 = vld [vmem:[#allocation10 + $0x1d0] sm:$0xff]  ;;  %v544_v22 = vld [vmem:[#allocation10 + $0x1a8] sm:$0xff]  ;;  %v546_v24 = vld [vmem:[#allocation10 + $0x1b8] sm:$0xff]  ;;  %s1129_s14 = scalar_lea.hbm %s1128_s8, 8  ;;  %p1134_p10 = scmp.lt.s32.totalorder %s1128_s8, %s1453_s6 }
  0x37   : > { %419 = vmatpush.msra.mxu1 %v393_v3  ;;  %384 = vmatpush.msra.mxu0 %v359_v9  ;;  %v991_v17 = vld [vmem:[%s1451_s4] ss:$0 sm:$0xff]  ;;  %v539_v25 = vld [vmem:[#allocation10 + $0x180] sm:$0xff]  ;;  %v540_v26 = vld [vmem:[#allocation10 + $0x188] sm:$0xff]  ;;  %p1130_p1 = scmp.ne.s32.totalorder %s1128_s8, %s1129_s14 }
  0x38   : > { %885 = vmatmul.msk.f32.vlgmr.msra.gmra.mxu1 %vm366_vm0, %v392_v4  ;;  %v545_v23 = vld [vmem:[#allocation10 + $0x1b0] sm:$0xff]  ;;  %557 = vmatpush.msra.mxu2 %v543_v21  ;;  %v542_v28 = vld [vmem:[#allocation10 + $0x198] sm:$0xff]  ;;  %v535_v29 = vld [vmem:[#allocation10 + $0x160] sm:$0xff] }
  0x39   : > { %615 = vmatpush.msrb.mxu1 %v554_v10  ;;  %385 = vmatpush.msra.mxu0 %v358_v14  ;;  %v541_v27 = vld [vmem:[#allocation10 + $0x190] sm:$0xff]  ;;  %v536_v30 = vld [vmem:[#allocation10 + $0x168] sm:$0xff]  ;;  %v538_v32 = vld [vmem:[#allocation10 + $0x178] sm:$0xff]  ;;  %p1131_p3 = pnand %p1130_p1, %p1341_p4 }
  0x3a   : > { %884 = vmatmul.msk.f32.vlgmr.msra.gmra.mxu0 %vm366_vm0, %v392_v4  ;;  %577 = vmatpush.msra.mxu3 %v544_v22  ;;  %v537_v31 = vld [vmem:[#allocation10 + $0x170] sm:$0xff]  ;;  %v531_v33 = vld [vmem:[#allocation10 + $0x140] sm:$0xff]  ;;  %v532_v34 = vld [vmem:[#allocation10 + $0x148] sm:$0xff] }
  0x3b   : > { %616 = vmatpush.msrb.mxu1 %v550_v13  ;;  %595 = vmatpush.msrb.mxu0 %v553_v15  ;;  %v533_v35 = vld [vmem:[#allocation10 + $0x150] sm:$0xff]  ;;  %v534_v36 = vld [vmem:[#allocation10 + $0x158] sm:$0xff]  ;;  %v527_v37 = vld [vmem:[#allocation10 + $0x120] sm:$0xff]  ;;  %p1132_p9 = pneg %p1131_p3 }
  0x3c   : > { %558 = vmatpush.msra.mxu2 %v539_v25  ;;  %578 = vmatpush.msra.mxu3 %v540_v26  ;;  %v528_v38 = vld [vmem:[#allocation10 + $0x128] sm:$0xff]  ;;  %v529_v39 = vld [vmem:[#allocation10 + $0x130] sm:$0xff]  ;;  %v530_v40 = vld [vmem:[#allocation10 + $0x138] sm:$0xff] }
  0x3d   : > { %596 = vmatpush.msrb.mxu0 %v549_v16  ;;  %617 = vmatpush.msrb.mxu1 %v546_v24  ;;  %v523_v41 = vld [vmem:[#allocation10 + $0x100] sm:$0xff]  ;;  %v524_v42 = vld [vmem:[#allocation10 + $0x108] sm:$0xff]  ;;  %v525_v43 = vld [vmem:[#allocation10 + $0x110] sm:$0xff] }
  0x3e   : > { %559 = vmatpush.msra.mxu2 %v535_v29  ;;  %579 = vmatpush.msra.mxu3 %v536_v30  ;;  %v526_v44 = vld [vmem:[#allocation10 + $0x118] sm:$0xff]  ;;  %v519_v45 = vld [vmem:[#allocation10 + $0xe0] sm:$0xff]  ;;  %v520_v46 = vld [vmem:[#allocation10 + $0xe8] sm:$0xff] }
  0x3f   : > { %597 = vmatpush.msrb.mxu0 %v545_v23  ;;  %618 = vmatpush.msrb.mxu1 %v542_v28  ;;  %v521_v47 = vld [vmem:[#allocation10 + $0xf0] sm:$0xff]  ;;  %v522_v48 = vld [vmem:[#allocation10 + $0xf8] sm:$0xff]  ;;  %v515_v49 = vld [vmem:[#allocation10 + $0xc0] sm:$0xff] }
  0x40   : > { %560 = vmatpush.msra.mxu2 %v531_v33  ;;  %580 = vmatpush.msra.mxu3 %v532_v34  ;;  %v516_v50 = vld [vmem:[#allocation10 + $0xc8] sm:$0xff]  ;;  %v517_v51 = vld [vmem:[#allocation10 + $0xd0] sm:$0xff]  ;;  %v518_v52 = vld [vmem:[#allocation10 + $0xd8] sm:$0xff] }
  0x41   : > { %598 = vmatpush.msrb.mxu0 %v541_v27  ;;  %619 = vmatpush.msrb.mxu1 %v538_v32  ;;  %v511_v53 = vld [vmem:[#allocation10 + $0xa0] sm:$0xff]  ;;  %v512_v54 = vld [vmem:[#allocation10 + $0xa8] sm:$0xff]  ;;  %v513_v55 = vld [vmem:[#allocation10 + $0xb0] sm:$0xff] }
  0x42   : > { %561 = vmatpush.msra.mxu2 %v527_v37  ;;  %581 = vmatpush.msra.mxu3 %v528_v38  ;;  %v514_v56 = vld [vmem:[#allocation10 + $0xb8] sm:$0xff]  ;;  %v507_v57 = vld [vmem:[#allocation10 + $0x80] sm:$0xff]  ;;  %v508_v58 = vld [vmem:[#allocation10 + $0x88] sm:$0xff] }
  0x43   : > { %599 = vmatpush.msrb.mxu0 %v537_v31  ;;  %620 = vmatpush.msrb.mxu1 %v534_v36  ;;  %v509_v59 = vld [vmem:[#allocation10 + $0x90] sm:$0xff]  ;;  %v510_v60 = vld [vmem:[#allocation10 + $0x98] sm:$0xff]  ;;  %v503_v61 = vld [vmem:[#allocation10 + $0x60] sm:$0xff] }
  0x44   : > { %562 = vmatpush.msra.mxu2 %v523_v41  ;;  %582 = vmatpush.msra.mxu3 %v524_v42  ;;  %v504_v62 = vld [vmem:[#allocation10 + $0x68] sm:$0xff]  ;;  %v505_v63 = vld [vmem:[#allocation10 + $0x70] sm:$0xff]  ;;  %v506_v0 = vld [vmem:[#allocation10 + $0x78] sm:$0xff] }
  0x45   : > { %600 = vmatpush.msrb.mxu0 %v533_v35  ;;  %621 = vmatpush.msrb.mxu1 %v530_v40  ;;  %v992_v2 = vld [vmem:[%s1449_s2] ss:$0 sm:$0xff]  ;;  %v499_v3 = vld [vmem:[#allocation10 + $0x40] sm:$0xff]  ;;  %v500_v4 = vld [vmem:[#allocation10 + $0x48] sm:$0xff] }
  0x46   : > { %563 = vmatpush.msra.mxu2 %v519_v45  ;;  %583 = vmatpush.msra.mxu3 %v520_v46  ;;  %v501_v5 = vld [vmem:[#allocation10 + $0x50] sm:$0xff]  ;;  %v502_v6 = vld [vmem:[#allocation10 + $0x58] sm:$0xff]  ;;  %v495_v8 = vld [vmem:[#allocation10 + $0x20] sm:$0xff] }
  0x47   : > { %601 = vmatpush.msrb.mxu0 %v529_v39  ;;  %622 = vmatpush.msrb.mxu1 %v526_v44  ;;  %v496_v9 = vld [vmem:[#allocation10 + $0x28] sm:$0xff]  ;;  %v497_v10 = vld [vmem:[#allocation10 + $0x30] sm:$0xff]  ;;  %v498_v12 = vld [vmem:[#allocation10 + $0x38] sm:$0xff] }
  0x48   : > { %564 = vmatpush.msra.mxu2 %v515_v49  ;;  %584 = vmatpush.msra.mxu3 %v516_v50  ;;  %v491_v13 = vld [vmem:[#allocation10] sm:$0xff]  ;;  %v492_v14 = vld [vmem:[#allocation10 + $0x8] sm:$0xff]  ;;  %v493_v15 = vld [vmem:[#allocation10 + $0x10] sm:$0xff] }
  0x49   : > { %602 = vmatpush.msrb.mxu0 %v525_v43  ;;  %623 = vmatpush.msrb.mxu1 %v522_v48  ;;  %v494_v16 = vld [vmem:[#allocation10 + $0x18] sm:$0xff] }
  0x4a   : > { %565 = vmatpush.msra.mxu2 %v511_v53  ;;  %585 = vmatpush.msra.mxu3 %v512_v54 }
  0x4b   : > { %603 = vmatpush.msrb.mxu0 %v521_v47  ;;  %624 = vmatpush.msrb.mxu1 %v518_v52 }
  0x4c   : > { %566 = vmatpush.msra.mxu2 %v507_v57  ;;  %586 = vmatpush.msra.mxu3 %v508_v58 }
  0x4d   : > { %604 = vmatpush.msrb.mxu0 %v517_v51  ;;  %625 = vmatpush.msrb.mxu1 %v514_v56 }
  0x4e   : > { %567 = vmatpush.msra.mxu2 %v503_v61  ;;  %587 = vmatpush.msra.mxu3 %v504_v62 }
  0x4f   : > { %605 = vmatpush.msrb.mxu0 %v513_v55  ;;  %626 = vmatpush.msrb.mxu1 %v510_v60 }
  0x50   : > { %568 = vmatpush.msra.mxu2 %v499_v3  ;;  %588 = vmatpush.msra.mxu3 %v500_v4 }
  0x51   : > { %606 = vmatpush.msrb.mxu0 %v509_v59  ;;  %627 = vmatpush.msrb.mxu1 %v506_v0 }
  0x52   : > { %569 = vmatpush.msra.mxu2 %v495_v8  ;;  %589 = vmatpush.msra.mxu3 %v496_v9 }
  0x53   : > { %607 = vmatpush.msrb.mxu0 %v505_v63  ;;  %628 = vmatpush.msrb.mxu1 %v502_v6 }
  0x54   : > { %570 = vmatpush.msra.mxu2 %v491_v13  ;;  %590 = vmatpush.msra.mxu3 %v492_v14 }
  0x55   : > { %608 = vmatpush.msrb.mxu0 %v501_v5  ;;  %629 = vmatpush.msrb.mxu1 %v498_v12 }
  0x57   : > { %609 = vmatpush.msrb.mxu0 %v497_v10  ;;  %630 = vmatpush.msrb.mxu1 %v494_v16 }
  0x59   : > { %610 = vmatpush.msrb.mxu0 %v493_v15 }
  0xb5   : > { %v421_v18 = vpop.f32.mrf.mxu1 }
  0xb6   : > { %v422_v19 = vadd.f32 %v991_v17, %v421_v18 }
  0xb7   : > { %v387_v1 = vpop.f32.mrf.mxu0 }
  0xb8   : > { %v424_v20 = vmax.f32 %v422_v19, 0.0  ;;  %v388_v7 = vadd.f32 %v992_v2, %v387_v1 }
  0xba   : > { %425 = vxpose.xlu0.b32.start.end [1/1] (short) %v424_v20, 128  ;;  %v390_v11 = vmax.f32 %v388_v7, 0.0 }
  0xbc   : > { %571 = vmatmul.f32.vlgmr.msra.gmra.mxu2 %v390_v11  ;;  %591 = vmatmul.f32.vlgmr.msra.gmra.mxu3 %v390_v11 }
  0xbd   : > { %611 = vmatmul.f32.vlgmr.msrb.gmra.mxu0 %v390_v11  ;;  %631 = vmatmul.f32.vlgmr.msrb.gmra.mxu1 %v390_v11 }
 0x13a   : > { %v612_v51 = vpop.f32.mrf.mxu0  ;;  %v632_v52 = vpop.f32.mrf.mxu1 }
 0x13f   : > { %v572_v48 = vpop.f32.mrf.mxu2  ;;  %v592_v49 = vpop.f32.mrf.mxu3 }
 0x15e   : > { %v441_v17 = vpop.trf.xlu0 }
 0x15f   : > { %458 = vst.msk [vmem:[#allocation3] sm:$0xff] %vm457_vm1, %v441_v17 }
 0x166   : > { %v442_v18 = vpop.trf.xlu0  ;;  %v475_v50 = vld [vmem:[#allocation3] sm:$0xff] }
 0x167   : > { %459 = vst.msk [vmem:[#allocation3 + $0x8] sm:$0xff] %vm457_vm1, %v442_v18 }
 0x16e   : > { %v443_v19 = vpop.trf.xlu0  ;;  %v476_v47 = vld [vmem:[#allocation3 + $0x8] sm:$0xff] }
 0x16f   : > { %460 = vst.msk [vmem:[#allocation3 + $0x10] sm:$0xff] %vm457_vm1, %v443_v19 }
 0x176   : > { %v444_v20 = vpop.trf.xlu0  ;;  %v477_v46 = vld [vmem:[#allocation3 + $0x10] sm:$0xff] }
 0x177   : > { %461 = vst.msk [vmem:[#allocation3 + $0x18] sm:$0xff] %vm457_vm1, %v444_v20 }
 0x17e   : > { %v445_v21 = vpop.trf.xlu0  ;;  %v478_v45 = vld [vmem:[#allocation3 + $0x18] sm:$0xff] }
 0x17f   : > { %462 = vst.msk [vmem:[#allocation3 + $0x20] sm:$0xff] %vm457_vm1, %v445_v21 }
 0x186   : > { %v446_v22 = vpop.trf.xlu0  ;;  %v479_v44 = vld [vmem:[#allocation3 + $0x20] sm:$0xff] }
 0x187   : > { %463 = vst.msk [vmem:[#allocation3 + $0x28] sm:$0xff] %vm457_vm1, %v446_v22 }
 0x18e   : > { %v447_v23 = vpop.trf.xlu0  ;;  %v480_v43 = vld [vmem:[#allocation3 + $0x28] sm:$0xff] }
 0x18f   : > { %464 = vst.msk [vmem:[#allocation3 + $0x30] sm:$0xff] %vm457_vm1, %v447_v23 }
 0x196   : > { %v448_v24 = vpop.trf.xlu0  ;;  %v481_v42 = vld [vmem:[#allocation3 + $0x30] sm:$0xff] }
 0x197   : > { %465 = vst.msk [vmem:[#allocation3 + $0x38] sm:$0xff] %vm457_vm1, %v448_v24 }
 0x19e   : > { %v449_v25 = vpop.trf.xlu0  ;;  %v482_v41 = vld [vmem:[#allocation3 + $0x38] sm:$0xff] }
 0x19f   : > { %466 = vst.msk [vmem:[#allocation3 + $0x40] sm:$0xff] %vm457_vm1, %v449_v25 }
 0x1a6   : > { %v450_v26 = vpop.trf.xlu0  ;;  %v483_v40 = vld [vmem:[#allocation3 + $0x40] sm:$0xff] }
 0x1a7   : > { %467 = vst.msk [vmem:[#allocation3 + $0x48] sm:$0xff] %vm457_vm1, %v450_v26 }
 0x1ae   : > { %v451_v27 = vpop.trf.xlu0  ;;  %v484_v39 = vld [vmem:[#allocation3 + $0x48] sm:$0xff] }
 0x1af   : > { %468 = vst.msk [vmem:[#allocation3 + $0x50] sm:$0xff] %vm457_vm1, %v451_v27 }
 0x1b6   : > { %v452_v28 = vpop.trf.xlu0  ;;  %v485_v38 = vld [vmem:[#allocation3 + $0x50] sm:$0xff] }
 0x1b7   : > { %469 = vst.msk [vmem:[#allocation3 + $0x58] sm:$0xff] %vm457_vm1, %v452_v28 }
 0x1be   : > { %v453_v29 = vpop.trf.xlu0  ;;  %v486_v37 = vld [vmem:[#allocation3 + $0x58] sm:$0xff] }
 0x1bf   : > { %470 = vst.msk [vmem:[#allocation3 + $0x60] sm:$0xff] %vm457_vm1, %v453_v29 }
 0x1c6   : > { %v454_v30 = vpop.trf.xlu0  ;;  %v487_v36 = vld [vmem:[#allocation3 + $0x60] sm:$0xff] }
 0x1c7   : > { %471 = vst.msk [vmem:[#allocation3 + $0x68] sm:$0xff] %vm457_vm1, %v454_v30 }
 0x1ce   : > { %v455_v31 = vpop.trf.xlu0  ;;  %v488_v35 = vld [vmem:[#allocation3 + $0x68] sm:$0xff] }
 0x1cf   : > { %472 = vst.msk [vmem:[#allocation3 + $0x70] sm:$0xff] %vm457_vm1, %v455_v31 }
 0x1d6   : > { %v456_v32 = vpop.trf.xlu0  ;;  %v489_v34 = vld [vmem:[#allocation3 + $0x70] sm:$0xff] }
 0x1d7   : > { %473 = vst.msk [vmem:[#allocation3 + $0x78] sm:$0xff] %vm457_vm1, %v456_v32 }
 0x1de   : > { %v490_v33 = vld [vmem:[#allocation3 + $0x78] sm:$0xff] }
 0x1df   : > { %635 = vmatpush.msrb.mxu2 %v490_v33  ;;  %655 = vmatpush.msrb.mxu3 %v490_v33 }
 0x1e0   : > { %675 = vmatpush.msra.mxu0 %v490_v33  ;;  %695 = vmatpush.msra.mxu1 %v490_v33 }
 0x1e1   : > { %636 = vmatpush.msrb.mxu2 %v489_v34  ;;  %656 = vmatpush.msrb.mxu3 %v489_v34 }
 0x1e2   : > { %676 = vmatpush.msra.mxu0 %v489_v34  ;;  %696 = vmatpush.msra.mxu1 %v489_v34 }
 0x1e3   : > { %637 = vmatpush.msrb.mxu2 %v488_v35  ;;  %657 = vmatpush.msrb.mxu3 %v488_v35 }
 0x1e4   : > { %677 = vmatpush.msra.mxu0 %v488_v35  ;;  %697 = vmatpush.msra.mxu1 %v488_v35 }
 0x1e5   : > { %638 = vmatpush.msrb.mxu2 %v487_v36  ;;  %658 = vmatpush.msrb.mxu3 %v487_v36 }
 0x1e6   : > { %678 = vmatpush.msra.mxu0 %v487_v36  ;;  %698 = vmatpush.msra.mxu1 %v487_v36 }
 0x1e7   : > { %639 = vmatpush.msrb.mxu2 %v486_v37  ;;  %659 = vmatpush.msrb.mxu3 %v486_v37 }
 0x1e8   : > { %679 = vmatpush.msra.mxu0 %v486_v37  ;;  %699 = vmatpush.msra.mxu1 %v486_v37 }
 0x1e9   : > { %640 = vmatpush.msrb.mxu2 %v485_v38  ;;  %660 = vmatpush.msrb.mxu3 %v485_v38 }
 0x1ea   : > { %680 = vmatpush.msra.mxu0 %v485_v38  ;;  %700 = vmatpush.msra.mxu1 %v485_v38 }
 0x1eb   : > { %641 = vmatpush.msrb.mxu2 %v484_v39  ;;  %661 = vmatpush.msrb.mxu3 %v484_v39 }
 0x1ec   : > { %681 = vmatpush.msra.mxu0 %v484_v39  ;;  %701 = vmatpush.msra.mxu1 %v484_v39 }
 0x1ed   : > { %642 = vmatpush.msrb.mxu2 %v483_v40  ;;  %662 = vmatpush.msrb.mxu3 %v483_v40 }
 0x1ee   : > { %682 = vmatpush.msra.mxu0 %v483_v40  ;;  %702 = vmatpush.msra.mxu1 %v483_v40 }
 0x1ef   : > { %643 = vmatpush.msrb.mxu2 %v482_v41  ;;  %663 = vmatpush.msrb.mxu3 %v482_v41 }
 0x1f0   : > { %683 = vmatpush.msra.mxu0 %v482_v41  ;;  %703 = vmatpush.msra.mxu1 %v482_v41 }
 0x1f1   : > { %644 = vmatpush.msrb.mxu2 %v481_v42  ;;  %664 = vmatpush.msrb.mxu3 %v481_v42 }
 0x1f2   : > { %684 = vmatpush.msra.mxu0 %v481_v42  ;;  %704 = vmatpush.msra.mxu1 %v481_v42 }
 0x1f3   : > { %645 = vmatpush.msrb.mxu2 %v480_v43  ;;  %665 = vmatpush.msrb.mxu3 %v480_v43 }
 0x1f4   : > { %685 = vmatpush.msra.mxu0 %v480_v43  ;;  %705 = vmatpush.msra.mxu1 %v480_v43 }
 0x1f5   : > { %646 = vmatpush.msrb.mxu2 %v479_v44  ;;  %666 = vmatpush.msrb.mxu3 %v479_v44 }
 0x1f6   : > { %686 = vmatpush.msra.mxu0 %v479_v44  ;;  %706 = vmatpush.msra.mxu1 %v479_v44 }
 0x1f7   : > { %647 = vmatpush.msrb.mxu2 %v478_v45  ;;  %667 = vmatpush.msrb.mxu3 %v478_v45 }
 0x1f8   : > { %687 = vmatpush.msra.mxu0 %v478_v45  ;;  %707 = vmatpush.msra.mxu1 %v478_v45 }
 0x1f9   : > { %648 = vmatpush.msrb.mxu2 %v477_v46  ;;  %668 = vmatpush.msrb.mxu3 %v477_v46 }
 0x1fa   : > { %688 = vmatpush.msra.mxu0 %v477_v46  ;;  %708 = vmatpush.msra.mxu1 %v477_v46 }
 0x1fb   : > { %649 = vmatpush.msrb.mxu2 %v476_v47  ;;  %669 = vmatpush.msrb.mxu3 %v476_v47 }
 0x1fc   : > { %689 = vmatpush.msra.mxu0 %v476_v47  ;;  %709 = vmatpush.msra.mxu1 %v476_v47 }
 0x1fd   : > { %650 = vmatpush.msrb.mxu2 %v475_v50  ;;  %670 = vmatpush.msrb.mxu3 %v475_v50 }
 0x1fe   : > { %690 = vmatpush.msra.mxu0 %v475_v50  ;;  %710 = vmatpush.msra.mxu1 %v475_v50 }
 0x1ff   : > { %651 = vmatmul.f32.vlgmr.msrb.gmra.mxu2 %v572_v48  ;;  %671 = vmatmul.f32.vlgmr.msrb.gmra.mxu3 %v592_v49 }
 0x200   : > { %691 = vmatmul.f32.vlgmr.msra.gmra.mxu0 %v612_v51  ;;  %711 = vmatmul.f32.vlgmr.msra.gmra.mxu1 %v632_v52 }
 0x27d   : > { %v692_v53 = vpop.f32.mrf.mxu0  ;;  %v712_v55 = vpop.f32.mrf.mxu1 }
 0x27e   : > { %720 = vrot.lane.b32.xlu1 %v692_v53, %s1212_s20  ;;  %s1133_s20 = scalar_lea.hbm %s1453_s6, 16 }
 0x27f   : > { %p1135_p11 = scmp.lt.s32.totalorder %s1133_s20, %s1129_s14 }
 0x281   : > { %p1136_p12 = por %p1135_p11, %p1134_p10 }
 0x282   : > { %v672_v54 = vpop.f32.mrf.mxu3  ;;  %v652_v57 = vpop.f32.mrf.mxu2 }
 0x283   : > { %716 = vrot.lane.b32.xlu0 %v672_v54, %s1213_s7  ;;  %p1137_p13 = pnand %p1136_p12, %p1132_p9 }
 0x286   : > { %724 = vrot.lane.b32.xlu1 %v712_v55, %s1214_s27 }
 0x2f0   : > { %v721_v56 = vpop.permute.xlu1 %720 }
 0x2f5   : > { %v717_v58 = vpop.permute.xlu0 %716 }
 0x2f6   : > { %v728_v59 = vsel %vm457_vm1, %v652_v57, %v717_v58 }
 0x2f7   : > { %v730_v60 = vsel %vm729_vm2, %v728_v59, %v721_v56 }
 0x2f8   : > { %v725_v61 = vpop.permute.xlu1 %724 }
 0x2f9   : > { %v732_v62 = vsel %vm731_vm3, %v730_v60, %v725_v61 }
 0x2fa   : > { %734 = vst.msk [vmem:[%s349_s29] sm:$0xff] %vm366_vm0, %v732_v62 }
 0x2fb   : > { %1140 = shalt.err (!%p1137_p13)
}
 0x2fc   : > { %904 = dma.vmem_to_hbm [thread:$0]  (%p1341_p4), %s751_s9, 128, %s753_s28, %s736_s24  }
 0x2fd PF: > { %s764_s1 = sand.u32 1, %s1183_s21   ;;  %p921_p0 = pnand %p875_p6, %p1349_p7 }
 0x2fe   : > { %s765_s10 = scalar_lea.sflag [#allocation6], %s764_s1 }
 0x2ff   : > { %p922_p2 = pneg %p921_p0 }
 0x301   : > { %1178 = dma.done.wait (%p922_p2), %s765_s10, 128  }
 0x302   : > { %1180 = vsyncadd (%p922_p2), %s765_s10, 4294967168  ;;  %s24_s26 = sadd.s32 1, %s1203_s26   ;;  %s1463_s21 = smov %s1187_s22 }
 0x303   : > { %p21_p5 = scmp.ge.s32.totalorder %s24_s26, 4   ;;  %s1464_s22 = smov %s1191_s23 }
 0x304   : > { %s1465_s23 = smov %s1347_s18  ;;  %s1466_s24 = smov %s1199_s25 }
 0x305   : > { %s1467_s25 = smov %s1469_s13  ;;  %23 = sbr.rel (!%p21_p5) target bundleno = 10 (0xa), region = 107 }
 0x30a   :  { %771 = vsyncpa [#allocation5], 1 }
 0x30b   :  { %773 = vsyncpa [#allocation5 + $0x1], 1 }
 0x30c   :  { %774 = vsyncpa [#allocation8], 1 }
 0x30d   :  { %775 = vsyncpa [#allocation11], 1 }
 0x30e   :  { %776 = vsyncpa [#allocation6], 1 }
 0x30f   :  { %778 = vsyncpa [#allocation6 + $0x1], 1 }

</bundles_post_ra>
